<compile_context>
chip_gen: v7x
topology: tpu7x:2x2x1
jax: 0.10.0
libtpu: 0.0.40
codegen_flags: <defaults>
</compile_context>

<pallas_src>
import jax
import jax.numpy as jnp
from jax.experimental import pallas as pl
from jax.experimental.pallas import tpu as pltpu

INPUT_DIM = 3     # FN_Net(input_dim=3, ...) as used for 3D marginal evaluation
HID = 256         # hid_size
OUTPUT_DIM = 1    # output_dim
MIN_TILE = 256    # multiple of 256: fills the MXU M dim, sublane-aligned
MAX_TILE = 2048   # ~7-8 MiB live VMEM at this size -> fits v5e/v6e/v7x defaults


def _round_up(x, m):
    return ((x + m - 1) // m) * m


def _pick_tile(n):
    """Batch-tile size: multiple of 256, capped at MAX_TILE, sized so the grid
    is >= 2 whenever n > MIN_TILE (v7x's two TensorCores both get work through
    the "parallel" grid axis).  For very large n the grid may end up odd (at
    most one tile of imbalance), which is acceptable."""
    tile = max(MIN_TILE, _round_up(-(-n // 2), MIN_TILE))
    return min(tile, MAX_TILE)


def _tpu_generation():
    """Best-effort TPU generation from device_kind ('TPU v6e' -> 6)."""
    try:
        kind = jax.devices()[0].device_kind.lower()
    except Exception:
        return 0
    for g in (7, 6, 5, 4, 3, 2):
        if f"v{g}" in kind:
            return g
    return 0


def _make_fn_net_kernel(use_bf16_act):
    """Build the fused kernel; `use_bf16_act` picks the tanh dtype (bf16 on
    v6e/v7x where the EUP has bf16, f32 everywhere else)."""
    act_dtype = jnp.bfloat16 if use_bf16_act else jnp.float32

    def kernel(x_ref, w1_ref, b1_ref, w2_ref, b2_ref, w3_ref, b3_ref, o_ref):
        x = x_ref[...]                                        # (TILE_N, INPUT_DIM) f32

        # ---- Layer 1: torch.tanh(self.input(x)) --------------------------
        # K = input_dim is tiny, so do it on the VPU as broadcast FMAs and
        # keep the MXU free for the hid x hid layer.
        h = x[:, 0:1] * w1_ref[0:1, :]
        for k in range(1, INPUT_DIM):                         # static, short loop
            h = h + x[:, k:k + 1] * w1_ref[k:k + 1, :]
        h = jnp.tanh((h + b1_ref[...]).astype(act_dtype))     # EUP; bf16 on v6e/v7x

        # ---- Layer 2: torch.tanh(self.fc1(x)) ----------------------------
        # The one real matmul: bf16 operands, f32 accumulation on the MXU.
        h = jnp.dot(h.astype(jnp.bfloat16), w2_ref[...],
                    preferred_element_type=jnp.float32)       # (TILE_N, HID) f32
        h = jnp.tanh((h + b2_ref[...]).astype(act_dtype))

        # ---- Layer 3: self.output(x) (linear, output_dim == 1) -----------
        # VPU multiply + XLU lane reduction (f32 accumulation) instead of an
        # MXU pass with N = 1.
        h32 = h.astype(jnp.float32)
        z = jnp.sum(h32 * w3_ref[...], axis=-1, keepdims=True) + b3_ref[...]
        o_ref[...] = z.astype(o_ref.dtype)                    # (TILE_N, 1)

    return kernel


def fn_net_forward(x, params, use_bf16_act=None):
    """x: (N, INPUT_DIM) float32 -> (N, OUTPUT_DIM) float32."""
    w1, b1, w2, b2, w3, b3 = params
    n = x.shape[0]

    if use_bf16_act is None:
        use_bf16_act = _tpu_generation() >= 6   # bf16 EUP only on v6e / v7x

    tile_n = _pick_tile(n)

    # Pad the batch so any N works (padded rows are discarded afterwards).
    n_pad = _round_up(n, tile_n)
    if n_pad != n:
        x = jnp.pad(x, ((0, n_pad - n), (0, 0)))
    grid = (n_pad // tile_n,)

    # Only the MXU operands are cast to bf16; biases / layer-3 weights stay f32.
    w2_bf16 = w2.astype(jnp.bfloat16)

    # Constant index_map -> weights/biases stay resident in VMEM across steps.
    resident = lambda shape: pl.BlockSpec(shape, lambda i: (0, 0))

    out = pl.pallas_call(
        _make_fn_net_kernel(use_bf16_act),
        out_shape=jax.ShapeDtypeStruct((n_pad, OUTPUT_DIM), jnp.float32),
        grid_spec=pltpu.PrefetchScalarGridSpec(
            num_scalar_prefetch=0,
            grid=grid,
            in_specs=[
                pl.BlockSpec((tile_n, INPUT_DIM), lambda i: (i, 0)),      # x tile
                resident((INPUT_DIM, HID)), resident((1, HID)),           # layer 1
                resident((HID, HID)),       resident((1, HID)),           # layer 2
                resident((OUTPUT_DIM, HID)), resident((1, OUTPUT_DIM)),   # layer 3
            ],
            out_specs=pl.BlockSpec((tile_n, OUTPUT_DIM), lambda i: (i, 0)),
        ),
        compiler_params=pltpu.CompilerParams(
            dimension_semantics=("parallel",)),  # batch tiles shard across TCs on v7x
    )(x, w1, b1, w2_bf16, b2, w3, b3)

    return out[:n]


def init_params(key):
    """PyTorch-style uniform(+-1/sqrt(fan_in)) init, weights pre-transposed."""
    def linear(key, fan_in, fan_out, w_shape):
        kw, kb = jax.random.split(key)
        bound = 1.0 / (fan_in ** 0.5)
        w = jax.random.uniform(kw, w_shape, jnp.float32, -bound, bound)
        b = jax.random.uniform(kb, (1, fan_out), jnp.float32, -bound, bound)
        return w, b

    k1, k2, k3 = jax.random.split(key, 3)
    w1, b1 = linear(k1, INPUT_DIM, HID, (INPUT_DIM, HID))     # (in, out)
    w2, b2 = linear(k2, HID, HID, (HID, HID))                 # (in, out)
    w3, b3 = linear(k3, HID, OUTPUT_DIM, (OUTPUT_DIM, HID))   # (out, in) row layout
    return (w1, b1, w2, b2, w3, b3)


if __name__ == "__main__":
    key = jax.random.PRNGKey(0)
    k_params, k_x = jax.random.split(key)

    params = init_params(k_params)
    N = 200  # not a multiple of the tile -> exercises padding; grid becomes 2
    x = jax.random.normal(k_x, (N, INPUT_DIM), dtype=jnp.float32)

    out = fn_net_forward(x, params)
    out = jax.block_until_ready(out)

    # Reference in plain f32 JAX (matches FN_Net.forward exactly).
    w1, b1, w2, b2, w3, b3 = params
    h = jnp.tanh(x @ w1 + b1)
    h = jnp.tanh(h @ w2 + b2)
    ref = h @ w3.T + b3

    assert out.shape == (N, OUTPUT_DIM)
    # Tolerance is loosened vs a pure-f32 path: layer 2 uses bf16 MXU operands
    # (f32 accumulation) and, on v6e/v7x, the tanh activations run in bf16;
    # combined error is a few 1e-3 absolute on outputs of O(0.4) magnitude.
    err = float(jnp.max(jnp.abs(out - ref)))
    assert jnp.allclose(out, ref, atol=2e-2, rtol=2e-2), f"max abs err {err}"

    print("KERNEL_OK")
</pallas_src>

<mosaic_0001>
module attributes {stable_mosaic.version = 11 : i64} {
  func.func @kernel(%arg0: i32, %arg1: memref<256x3xf32, #tpu.memory_space<vmem>>, %arg2: memref<3x256xf32, #tpu.memory_space<vmem>>, %arg3: memref<1x256xf32, #tpu.memory_space<vmem>>, %arg4: memref<256x256xbf16, #tpu.memory_space<vmem>>, %arg5: memref<1x256xf32, #tpu.memory_space<vmem>>, %arg6: memref<1x256xf32, #tpu.memory_space<vmem>>, %arg7: memref<1x1xf32, #tpu.memory_space<vmem>>, %arg8: memref<256x1xf32, #tpu.memory_space<vmem>>) attributes {dimension_semantics = [#tpu.dimension_semantics<parallel>], iteration_bounds = array<i64: 1>, scalar_prefetch = 0 : i64, scratch_operands = 0 : i64, tpu.core_type = #tpu.core_type<tc>, window_params = [{transform_indices = @transform_0, window_bounds = array<i64: 256, 3>}, {pipeline_mode = #tpu.pipeline_mode<synchronous>, transform_indices = @transform_1, window_bounds = array<i64: 3, 256>}, {pipeline_mode = #tpu.pipeline_mode<synchronous>, transform_indices = @transform_2, window_bounds = array<i64: 1, 256>}, {pipeline_mode = #tpu.pipeline_mode<synchronous>, transform_indices = @transform_3, window_bounds = array<i64: 256, 256>}, {pipeline_mode = #tpu.pipeline_mode<synchronous>, transform_indices = @transform_4, window_bounds = array<i64: 1, 256>}, {pipeline_mode = #tpu.pipeline_mode<synchronous>, transform_indices = @transform_5, window_bounds = array<i64: 1, 256>}, {pipeline_mode = #tpu.pipeline_mode<synchronous>, transform_indices = @transform_6, window_bounds = array<i64: 1, 1>}, {transform_indices = @transform_7, window_bounds = array<i64: 256, 1>}]} {
    %c0 = arith.constant 0 : index
    %c0_0 = arith.constant 0 : index
    %0 = vector.load %arg1[%c0, %c0_0] : memref<256x3xf32, #tpu.memory_space<vmem>>, vector<256x3xf32>
    %1 = vector.extract_strided_slice %0 {offsets = [0, 0], sizes = [256, 1], strides = [1, 1]} : vector<256x3xf32> to vector<256x1xf32>
    %c0_1 = arith.constant 0 : index
    %c0_2 = arith.constant 0 : index
    %2 = vector.load %arg2[%c0_1, %c0_2] : memref<3x256xf32, #tpu.memory_space<vmem>>, vector<1x256xf32>
    %3 = vector.broadcast %1 : vector<256x1xf32> to vector<256x256xf32>
    %4 = vector.broadcast %2 : vector<1x256xf32> to vector<256x256xf32>
    %5 = arith.mulf %3, %4 : vector<256x256xf32>
    %6 = vector.extract_strided_slice %0 {offsets = [0, 1], sizes = [256, 1], strides = [1, 1]} : vector<256x3xf32> to vector<256x1xf32>
    %c1 = arith.constant 1 : index
    %c0_3 = arith.constant 0 : index
    %7 = vector.load %arg2[%c1, %c0_3] : memref<3x256xf32, #tpu.memory_space<vmem>>, vector<1x256xf32>
    %8 = vector.broadcast %6 : vector<256x1xf32> to vector<256x256xf32>
    %9 = vector.broadcast %7 : vector<1x256xf32> to vector<256x256xf32>
    %10 = arith.mulf %8, %9 : vector<256x256xf32>
    %11 = arith.addf %5, %10 : vector<256x256xf32>
    %12 = vector.extract_strided_slice %0 {offsets = [0, 2], sizes = [256, 1], strides = [1, 1]} : vector<256x3xf32> to vector<256x1xf32>
    %c2 = arith.constant 2 : index
    %c0_4 = arith.constant 0 : index
    %13 = vector.load %arg2[%c2, %c0_4] : memref<3x256xf32, #tpu.memory_space<vmem>>, vector<1x256xf32>
    %14 = vector.broadcast %12 : vector<256x1xf32> to vector<256x256xf32>
    %15 = vector.broadcast %13 : vector<1x256xf32> to vector<256x256xf32>
    %16 = arith.mulf %14, %15 : vector<256x256xf32>
    %17 = arith.addf %11, %16 : vector<256x256xf32>
    %c0_5 = arith.constant 0 : index
    %c0_6 = arith.constant 0 : index
    %18 = vector.load %arg3[%c0_5, %c0_6] : memref<1x256xf32, #tpu.memory_space<vmem>>, vector<1x256xf32>
    %19 = vector.broadcast %18 : vector<1x256xf32> to vector<256x256xf32>
    %20 = arith.addf %17, %19 : vector<256x256xf32>
    %21 = math.tanh %20 : vector<256x256xf32>
    %22 = arith.truncf %21 : vector<256x256xf32> to vector<256x256xbf16>
    %c0_7 = arith.constant 0 : index
    %c0_8 = arith.constant 0 : index
    %23 = vector.load %arg4[%c0_7, %c0_8] : memref<256x256xbf16, #tpu.memory_space<vmem>>, vector<256x256xbf16>
    %cst = arith.constant dense<0.000000e+00> : vector<256x256xf32>
    %24 = tpu.matmul %22, %23, %cst {dimension_numbers = #tpu.dot_dimension_numbers<[1], [0], [0], [1], [0, 0, 1, 1], [], []>} : vector<256x256xbf16>, vector<256x256xbf16>, vector<256x256xf32> -> vector<256x256xf32>
    %c0_9 = arith.constant 0 : index
    %c0_10 = arith.constant 0 : index
    %25 = vector.load %arg5[%c0_9, %c0_10] : memref<1x256xf32, #tpu.memory_space<vmem>>, vector<1x256xf32>
    %26 = vector.broadcast %25 : vector<1x256xf32> to vector<256x256xf32>
    %27 = arith.addf %24, %26 : vector<256x256xf32>
    %28 = math.tanh %27 : vector<256x256xf32>
    %c0_11 = arith.constant 0 : index
    %c0_12 = arith.constant 0 : index
    %29 = vector.load %arg6[%c0_11, %c0_12] : memref<1x256xf32, #tpu.memory_space<vmem>>, vector<1x256xf32>
    %30 = vector.broadcast %29 : vector<1x256xf32> to vector<256x256xf32>
    %31 = arith.mulf %28, %30 : vector<256x256xf32>
    %cst_13 = arith.constant dense<0.000000e+00> : vector<256xf32>
    %32 = vector.multi_reduction <add>, %31, %cst_13 [1] : vector<256x256xf32> to vector<256xf32>
    %33 = vector.shape_cast %32 : vector<256xf32> to vector<256x1xf32>
    %c0_14 = arith.constant 0 : index
    %c0_15 = arith.constant 0 : index
    %34 = vector.load %arg7[%c0_14, %c0_15] : memref<1x1xf32, #tpu.memory_space<vmem>>, vector<1x1xf32>
    %35 = vector.broadcast %34 : vector<1x1xf32> to vector<256x1xf32>
    %36 = arith.addf %33, %35 : vector<256x1xf32>
    %c0_16 = arith.constant 0 : index
    %c0_17 = arith.constant 0 : index
    %37 = vector.load %arg8[%c0_16, %c0_17] : memref<256x1xf32, #tpu.memory_space<vmem>>, vector<256x1xf32>
    tpu.vector_store %arg8[%c0_16, %c0_17], %36 {strides = array<i32>} : memref<256x1xf32, #tpu.memory_space<vmem>>, vector<256x1xf32>,
    return
  }
  func.func @transform_0(%arg0: i32) -> (i32, i32) {
    %c0_i32 = arith.constant 0 : i32
    %c0_i32_0 = arith.constant 0 : i32
    return %arg0, %c0_i32 : i32, i32
  }
  func.func @transform_1(%arg0: i32) -> (i32, i32) {
    %c0_i32 = arith.constant 0 : i32
    %c0_i32_0 = arith.constant 0 : i32
    %c0_i32_1 = arith.constant 0 : i32
    return %c0_i32, %c0_i32_0 : i32, i32
  }
  func.func @transform_2(%arg0: i32) -> (i32, i32) {
    %c0_i32 = arith.constant 0 : i32
    %c0_i32_0 = arith.constant 0 : i32
    %c0_i32_1 = arith.constant 0 : i32
    return %c0_i32, %c0_i32_0 : i32, i32
  }
  func.func @transform_3(%arg0: i32) -> (i32, i32) {
    %c0_i32 = arith.constant 0 : i32
    %c0_i32_0 = arith.constant 0 : i32
    %c0_i32_1 = arith.constant 0 : i32
    return %c0_i32, %c0_i32_0 : i32, i32
  }
  func.func @transform_4(%arg0: i32) -> (i32, i32) {
    %c0_i32 = arith.constant 0 : i32
    %c0_i32_0 = arith.constant 0 : i32
    %c0_i32_1 = arith.constant 0 : i32
    return %c0_i32, %c0_i32_0 : i32, i32
  }
  func.func @transform_5(%arg0: i32) -> (i32, i32) {
    %c0_i32 = arith.constant 0 : i32
    %c0_i32_0 = arith.constant 0 : i32
    %c0_i32_1 = arith.constant 0 : i32
    return %c0_i32, %c0_i32_0 : i32, i32
  }
  func.func @transform_6(%arg0: i32) -> (i32, i32) {
    %c0_i32 = arith.constant 0 : i32
    %c0_i32_0 = arith.constant 0 : i32
    %c0_i32_1 = arith.constant 0 : i32
    return %c0_i32, %c0_i32_0 : i32, i32
  }
  func.func @transform_7(%arg0: i32) -> (i32, i32) {
    %c0_i32 = arith.constant 0 : i32
    %c0_i32_0 = arith.constant 0 : i32
    return %arg0, %c0_i32 : i32, i32
  }
}

</mosaic_0001>

<bundles_post_ra>
// kernel: tpu_custom_call.1
= control target key start
LH: loop header
LB: loop body
LE: loop exit
PB: predicated region body
PF: predicated region fallthrough
CT: control target
= control target key end

     0   :  { %v3264_v0 = vmov 1   ;;  %v2119_v1 = vmov 0   ;;  %v2120_v7 = vmov 2   ;;  %vm1678_vm0 = vcmask 7168   ;;  %s3256_s0 = inlined_call_operand.vmem [shape: f32[256,3], index: 0, kind: input, shape index: {}]   ;;  %s3257_s3 = inlined_call_operand.vmem [shape: bf16[256,256], index: 3, kind: input, shape index: {}]   ;;  %s3258_s1 = inlined_call_operand.vmem [shape: f32[3,256], index: 1, kind: input, shape index: {}]   ;;  %s3259_s2 = inlined_call_operand.vmem [shape: f32[1,256], index: 2, kind: input, shape index: {}]   ;;  %s3260_s4 = inlined_call_operand.vmem [shape: f32[1,256], index: 4, kind: input, shape index: {}]   ;;  %s3261_s5 = inlined_call_operand.vmem [shape: f32[1,256], index: 5, kind: input, shape index: {}]   ;;  %s3262_s6 = inlined_call_operand.<no memory space> [shape: f32[1,1], index: 6, kind: input, shape index: {}]   ;;  %s3263_s7 = inlined_call_operand.vmem [shape: f32[256,1], index: 7, kind: output, shape index: {}]  }
   0x1   :  { %1786 = vset.pattern.permute.xlu0 %v3264_v0  ;;  %1785 = vset.pattern.permute.xlu1 %v2119_v1  ;;  %v2166_v2 = vld [vmem:[%s3256_s0 + $0x10] sm:$0xff]  ;;  %v2171_v3 = vld [vmem:[%s3256_s0] sm:$0xff]  ;;  %v2178_v4 = vld [vmem:[%s3256_s0 + $0x18] sm:$0xff] }
   0x2   :  { %73 = vperm.xlu1 %1785, %v2166_v2   ;;  %299 = vperm.xlu0 %1786, %v2171_v3   ;;  %v45_v5 = vld [vmem:[%s3256_s0 + $0x88] sm:$0xff]  ;;  %v1817_v10 = vld [vmem:[%s3257_s3 + $0x14] ss:$8 sps:$4 sm:$0xff]   ;;  %v1819_v11 = vld [vmem:[%s3257_s3 + $0x10] ss:$8 sps:$4 sm:$0xff]  }
   0x3   :  { %v2187_v6 = vld [vmem:[%s3256_s0 + $0x8] sm:$0xff]  ;;  %v2207_v12 = vld [vmem:[%s3256_s0 + $0x80] sm:$0xff]  ;;  %v2212_v13 = vld [vmem:[%s3256_s0 + $0x98] sm:$0xff] }
   0x4   :  { %v1814_v8 = vld [vmem:[%s3257_s3 + $0x4] ss:$8 sps:$4 sm:$0xff]   ;;  %v1816_v9 = vld [vmem:[%s3257_s3] ss:$8 sps:$4 sm:$0xff]   ;;  %v1823_v17 = vld [vmem:[%s3257_s3 + $0x34] ss:$8 sps:$4 sm:$0xff]  }
   0x5   :  { %1210 = vmatprep.subr.bf16.mxu0 %v1814_v8  ;;  %1750 = vmatprep.subr.bf16.mxu1 %v1814_v8  ;;  %v1820_v14 = vld [vmem:[%s3257_s3 + $0x24] ss:$8 sps:$4 sm:$0xff]   ;;  %v1822_v15 = vld [vmem:[%s3257_s3 + $0x20] ss:$8 sps:$4 sm:$0xff]   ;;  %v1825_v18 = vld [vmem:[%s3257_s3 + $0x30] ss:$8 sps:$4 sm:$0xff]  }
   0x6   :  { %78 = vperm.xlu1 %1785, %v2178_v4   ;;  %367 = vperm.xlu0 %1786, %v45_v5   ;;  %v2225_v16 = vld [vmem:[%s3256_s0 + $0x28] sm:$0xff]  ;;  %v2241_v19 = vld [vmem:[%s3256_s0 + $0x30] sm:$0xff]  ;;  %v2254_v22 = vld [vmem:[%s3256_s0 + $0xb8] sm:$0xff] }
   0x7   :  { %1211 = vmatpush1.bf16.msra.mxu0 %v1816_v9  ;;  %1766 = vmatpush1.bf16.msra.mxu1 %v1816_v9  ;;  %v1826_v20 = vld [vmem:[%s3257_s3 + $0x44] ss:$8 sps:$4 sm:$0xff]   ;;  %v1828_v21 = vld [vmem:[%s3257_s3 + $0x40] ss:$8 sps:$4 sm:$0xff]   ;;  %v1829_v23 = vld [vmem:[%s3257_s3 + $0x54] ss:$8 sps:$4 sm:$0xff]  }
   0x8   :  { %1212 = vmatprep.subr.bf16.mxu0 %v1817_v10  ;;  %1751 = vmatprep.subr.bf16.mxu1 %v1817_v10  ;;  %v1831_v24 = vld [vmem:[%s3257_s3 + $0x50] ss:$8 sps:$4 sm:$0xff]   ;;  %v2266_v25 = vld [vmem:[%s3256_s0 + $0x48] sm:$0xff]  ;;  %v1835_v29 = vld [vmem:[%s3257_s3 + $0x74] ss:$8 sps:$4 sm:$0xff]  }
   0x9   :  { %v1832_v26 = vld [vmem:[%s3257_s3 + $0x64] ss:$8 sps:$4 sm:$0xff]   ;;  %v1834_v27 = vld [vmem:[%s3257_s3 + $0x60] ss:$8 sps:$4 sm:$0xff]   ;;  %v2279_v28 = vld [vmem:[%s3256_s0 + $0x50] sm:$0xff] }
   0xa   :  { %148 = vperm.xlu1 %1785, %v45_v5   ;;  %1789 = vset.pattern.permute.xlu0 %v2120_v7  ;;  %v1837_v30 = vld [vmem:[%s3257_s3 + $0x70] ss:$8 sps:$4 sm:$0xff]   ;;  %v1838_v32 = vld [vmem:[%s3257_s3 + $0x84] ss:$8 sps:$4 sm:$0xff]   ;;  %v1840_v33 = vld [vmem:[%s3257_s3 + $0x80] ss:$8 sps:$4 sm:$0xff]  }
   0xb   :  { %572 = vperm.xlu0 %1789, %v2187_v6   ;;  %1213 = vmatpush1.bf16.msra.mxu0 %v1819_v11  ;;  %v2292_v31 = vld [vmem:[%s3256_s0 + $0xd8] sm:$0xff]  ;;  %v46_v34 = vld [vmem:[%s3256_s0 + $0x90] sm:$0xff]  ;;  %v1844_v37 = vld [vmem:[%s3257_s3 + $0xa4] ss:$8 sps:$4 sm:$0xff]  }
   0xc   :  { %1767 = vmatpush1.bf16.msra.mxu1 %v1819_v11  ;;  %1214 = vmatprep.subr.bf16.mxu0 %v1820_v14  ;;  %v1841_v35 = vld [vmem:[%s3257_s3 + $0x94] ss:$8 sps:$4 sm:$0xff]   ;;  %v1843_v36 = vld [vmem:[%s3257_s3 + $0x90] ss:$8 sps:$4 sm:$0xff]   ;;  %v1846_v38 = vld [vmem:[%s3257_s3 + $0xa0] ss:$8 sps:$4 sm:$0xff]  }
   0xd   :  { %1752 = vmatprep.subr.bf16.mxu1 %v1820_v14  ;;  %v1847_v39 = vld [vmem:[%s3257_s3 + $0xb4] ss:$8 sps:$4 sm:$0xff]   ;;  %v1849_v40 = vld [vmem:[%s3257_s3 + $0xb0] ss:$8 sps:$4 sm:$0xff]   ;;  %v1850_v41 = vld [vmem:[%s3257_s3 + $0xc4] ss:$8 sps:$4 sm:$0xff]  }
   0xe   :  { %1787 = vset.pattern.permute.xlu1 %v3264_v0  ;;  %v1852_v42 = vld [vmem:[%s3257_s3 + $0xc0] ss:$8 sps:$4 sm:$0xff]   ;;  %v1853_v44 = vld [vmem:[%s3257_s3 + $0xd4] ss:$8 sps:$4 sm:$0xff]   ;;  %v1855_v45 = vld [vmem:[%s3257_s3 + $0xd0] ss:$8 sps:$4 sm:$0xff]  }
   0xf   :  { %303 = vperm.xlu1 %1787, %v2187_v6   ;;  %576 = vperm.xlu0 %1789, %v2166_v2   ;;  %v32_v43 = vld [vmem:[%s3256_s0 + $0x20] sm:$0xff]  ;;  %v49_v49 = vld [vmem:[%s3256_s0 + $0xa8] sm:$0xff]  ;;  %v1859_v50 = vld [vmem:[%s3257_s3 + $0xf4] ss:$8 sps:$4 sm:$0xff]  }
  0x10   :  { %1215 = vmatpush1.bf16.msra.mxu0 %v1822_v15  ;;  %1768 = vmatpush1.bf16.msra.mxu1 %v1822_v15  ;;  %v48_v46 = vld [vmem:[%s3256_s0 + $0xa0] sm:$0xff]  ;;  %v1861_v51 = vld [vmem:[%s3257_s3 + $0xf0] ss:$8 sps:$4 sm:$0xff]   ;;  %v2377_v52 = vld [vmem:[%s3256_s0 + $0x68] sm:$0xff] }
  0x11   :  { %1216 = vmatprep.subr.bf16.mxu0 %v1823_v17  ;;  %1753 = vmatprep.subr.bf16.mxu1 %v1823_v17  ;;  %v1856_v47 = vld [vmem:[%s3257_s3 + $0xe4] ss:$8 sps:$4 sm:$0xff]   ;;  %v1858_v48 = vld [vmem:[%s3257_s3 + $0xe0] ss:$8 sps:$4 sm:$0xff]   ;;  %v2383_v53 = vld [vmem:[%s3256_s0 + $0x70] sm:$0xff]  ;;  %v222_v17 = vlaneseq }
  0x12   :  { %v2389_v54 = vld [vmem:[%s3256_s0 + $0xf8] sm:$0xff]  ;;  %v50_v56 = vld [vmem:[%s3256_s0 + $0xb0] sm:$0xff]  ;;  %v36_v57 = vld [vmem:[%s3256_s0 + $0x40] sm:$0xff] }
  0x13   :  { %363 = vperm.xlu1 %1787, %v2207_v12   ;;  %644 = vperm.xlu0 %1789, %v2212_v13   ;;  %v35_v55 = vld [vmem:[%s3256_s0 + $0x38] sm:$0xff]  ;;  %v53_v58 = vld [vmem:[%s3256_s0 + $0xc8] sm:$0xff]  ;;  %v2420_v60 = vld [vmem:[%s3256_s0 + $0x60] sm:$0xff] }
  0x14   :  { %1217 = vmatpush1.bf16.msra.mxu0 %v1825_v18  ;;  %1769 = vmatpush1.bf16.msra.mxu1 %v1825_v18  ;;  %v2414_v59 = vld [vmem:[%s3256_s0 + $0x58] sm:$0xff]  ;;  %v2431_v63 = vld [vmem:[%s3256_s0 + $0xe8] sm:$0xff] }
  0x15   :  { %1218 = vmatprep.subr.bf16.mxu0 %v1826_v20  ;;  %1754 = vmatprep.subr.bf16.mxu1 %v1826_v20  ;;  %v223_v20 = vshrl.u32 %v222_v17, 7 }
  0x17   :  { %1788 = vset.pattern.permute.xlu1 %v2120_v7  ;;  %588 = vperm.xlu0 %1789, %v2225_v16  }
  0x18   :  { %568 = vperm.xlu1 %1788, %v2171_v3   ;;  %1219 = vmatpush1.bf16.msra.mxu0 %v1828_v21 }
  0x19   :  { %1770 = vmatpush1.bf16.msra.mxu1 %v1828_v21  ;;  %1220 = vmatprep.subr.bf16.mxu0 %v1829_v23 }
  0x1a   :  { %1755 = vmatprep.subr.bf16.mxu1 %v1829_v23 }
  0x1b   :  { %592 = vperm.xlu0 %1789, %v2241_v19  }
  0x1c   :  { %632 = vperm.xlu1 %1788, %v2207_v12   ;;  %1221 = vmatpush1.bf16.msra.mxu0 %v1831_v24 }
  0x1d   :  { %1771 = vmatpush1.bf16.msra.mxu1 %v1831_v24  ;;  %1222 = vmatprep.subr.bf16.mxu0 %v1832_v26  ;;  %v2480_v24 = vsub.s32 0, %v223_v20 }
  0x1e   :  { %1756 = vmatprep.subr.bf16.mxu1 %v1832_v26 }
  0x1f   :  { %660 = vperm.xlu0 %1789, %v2254_v22  }
  0x20   :  { %636 = vperm.xlu1 %1788, %v45_v5   ;;  %1223 = vmatpush1.bf16.msra.mxu0 %v1834_v27  ;;  %v2442_v5 = vld [vmem:[%s3256_s0 + $0x78] sm:$0xff] }
  0x21   :  { %1772 = vmatpush1.bf16.msra.mxu1 %v1834_v27  ;;  %1224 = vmatprep.subr.bf16.mxu0 %v1835_v29  ;;  %v2491_v27 = vld [vmem:[%s3256_s0 + $0xd0] sm:$0xff] }
  0x22   :  { %1757 = vmatprep.subr.bf16.mxu1 %v1835_v29  ;;  %v2493_v29 = vsub.s32 1, %v223_v20 }
  0x23   :  { %604 = vperm.xlu0 %1789, %v2266_v25  }
  0x24   :  { %1790 = vset.pattern.permute.xlu1 %v2119_v1  ;;  %1225 = vmatpush1.bf16.msra.mxu0 %v1837_v30 }
  0x25   :  { %158 = vperm.xlu1 %1790, %v2212_v13   ;;  %1773 = vmatpush1.bf16.msra.mxu1 %v1837_v30 }
  0x26   :  { %1226 = vmatprep.subr.bf16.mxu0 %v1838_v32  ;;  %1758 = vmatprep.subr.bf16.mxu1 %v1838_v32  ;;  %v1716_v32 = vld [vmem:[%s3258_s1 + $0x2] ss:$4 sm:$0x3] }
  0x27   :  { %608 = vperm.xlu0 %1789, %v2279_v28  }
  0x28   :  { %1227 = vmatpush1.bf16.msra.mxu0 %v1840_v33 }
  0x29   :  { %1791 = vset.pattern.permute.xlu1 %v3264_v0  ;;  %1774 = vmatpush1.bf16.msra.mxu1 %v1840_v33 }
  0x2a   :  { %307 = vperm.xlu1 %1791, %v2166_v2   ;;  %1228 = vmatprep.subr.bf16.mxu0 %v1841_v35  ;;  %v52_v2 = vld [vmem:[%s3256_s0 + $0xc0] sm:$0xff] }
  0x2b   :  { %676 = vperm.xlu0 %1789, %v2292_v31   ;;  %1759 = vmatprep.subr.bf16.mxu1 %v1841_v35 }
  0x2c   :  { %1229 = vmatpush1.bf16.msra.mxu0 %v1843_v36 }
  0x2d   :  { %1775 = vmatpush1.bf16.msra.mxu1 %v1843_v36  ;;  %1230 = vmatprep.subr.bf16.mxu0 %v1844_v37 }
  0x2e   :  { %371 = vperm.xlu1 %1791, %v46_v34   ;;  %1760 = vmatprep.subr.bf16.mxu1 %v1844_v37 }
  0x2f   :  { %1805 = vset.pattern.permute.xlu0 %v2119_v1 }
  0x30   :  { %63 = vperm.xlu0 %1805, %v2171_v3   ;;  %1231 = vmatpush1.bf16.msra.mxu0 %v1846_v38 }
  0x31   :  { %1776 = vmatpush1.bf16.msra.mxu1 %v1846_v38  ;;  %1232 = vmatprep.subr.bf16.mxu0 %v1847_v39 }
  0x32   :  { %375 = vperm.xlu1 %1791, %v2212_v13   ;;  %1761 = vmatprep.subr.bf16.mxu1 %v1847_v39 }
  0x34   :  { %68 = vperm.xlu0 %1805, %v2187_v6   ;;  %1233 = vmatpush1.bf16.msra.mxu0 %v1849_v40 }
  0x35   :  { %1777 = vmatpush1.bf16.msra.mxu1 %v1849_v40  ;;  %1234 = vmatprep.subr.bf16.mxu0 %v1850_v41  ;;  %v2518_v40 = vrot.slane %v1716_v32, %v2480_v24 }
  0x36   :  { %1792 = vset.pattern.permute.xlu1 %v2120_v7  ;;  %1762 = vmatprep.subr.bf16.mxu1 %v1850_v41 }
  0x37   :  { %580 = vperm.xlu1 %1792, %v2178_v4  }
  0x38   :  { %143 = vperm.xlu0 %1805, %v2207_v12   ;;  %1235 = vmatpush1.bf16.msra.mxu0 %v1852_v42 }
  0x39   :  { %1778 = vmatpush1.bf16.msra.mxu1 %v1852_v42  ;;  %1236 = vmatprep.subr.bf16.mxu0 %v1853_v44 }
  0x3a   :  { %1763 = vmatprep.subr.bf16.mxu1 %v1853_v44  ;;  %v834_v44 = vld [vmem:[%s3259_s2] sm:$0x3] }
  0x3b   :  { %640 = vperm.xlu1 %1792, %v46_v34  }
  0x3c   :  { %153 = vperm.xlu0 %1805, %v46_v34   ;;  %1237 = vmatpush1.bf16.msra.mxu0 %v1855_v45 }
  0x3d   :  { %1779 = vmatpush1.bf16.msra.mxu1 %v1855_v45  ;;  %1238 = vmatprep.subr.bf16.mxu0 %v1856_v47 }
  0x3e   :  { %1764 = vmatprep.subr.bf16.mxu1 %v1856_v47 }
  0x3f   :  { %1793 = vset.pattern.permute.xlu1 %v2119_v1 }
  0x40   :  { %83 = vperm.xlu1 %1793, %v32_v43   ;;  %88 = vperm.xlu0 %1805, %v2225_v16  }
  0x41   :  { %1239 = vmatpush1.bf16.msra.mxu0 %v1858_v48  ;;  %1780 = vmatpush1.bf16.msra.mxu1 %v1858_v48 }
  0x42   :  { %1240 = vmatprep.subr.bf16.mxu0 %v1859_v50  ;;  %1765 = vmatprep.subr.bf16.mxu1 %v1859_v50 }
  0x44   :  { %163 = vperm.xlu1 %1793, %v48_v46   ;;  %93 = vperm.xlu0 %1805, %v2241_v19  }
  0x45   :  { %1241 = vmatpush1.bf16.msra.mxu0 %v1861_v51  ;;  %1781 = vmatpush1.bf16.msra.mxu1 %v1861_v51 }
  0x48   :  { %168 = vperm.xlu1 %1793, %v49_v49   ;;  %178 = vperm.xlu0 %1805, %v2254_v22  }
  0x4c   :  { %1794 = vset.pattern.permute.xlu1 %v3264_v0  ;;  %108 = vperm.xlu0 %1805, %v2266_v25  }
  0x4d   :  { %319 = vperm.xlu1 %1794, %v2225_v16  }
  0x50   :  { %113 = vperm.xlu0 %1805, %v2279_v28  }
  0x51   :  { %379 = vperm.xlu1 %1794, %v48_v46  }
  0x54   :  { %198 = vperm.xlu0 %1805, %v2292_v31  }
  0x55   :  { %1795 = vset.pattern.permute.xlu1 %v2120_v7 }
  0x56   :  { %584 = vperm.xlu1 %1795, %v32_v43  }
  0x58   :  { %128 = vperm.xlu0 %1805, %v2377_v52  }
  0x5a   :  { %648 = vperm.xlu1 %1795, %v48_v46  }
  0x5c   :  { %133 = vperm.xlu0 %1805, %v2383_v53  }
  0x5e   :  { %652 = vperm.xlu1 %1795, %v49_v49  }
  0x60   :  { %218 = vperm.xlu0 %1805, %v2389_v54  }
  0x62   :  { %1796 = vset.pattern.permute.xlu1 %v2119_v1 }
  0x63   :  { %98 = vperm.xlu1 %1796, %v35_v55  }
  0x64   :  { %1810 = vset.pattern.permute.xlu0 %v3264_v0 }
  0x65   :  { %311 = vperm.xlu0 %1810, %v2178_v4  }
  0x67   :  { %173 = vperm.xlu1 %1796, %v50_v56  }
  0x69   :  { %315 = vperm.xlu0 %1810, %v32_v43   ;;  %v2523_v43 = vrot.slane %v1716_v32, %v2493_v29 }
  0x6b   :  { %1797 = vset.pattern.permute.xlu1 %v3264_v0 }
  0x6c   :  { %323 = vperm.xlu1 %1797, %v2241_v19  }
  0x6d   :  { %383 = vperm.xlu0 %1810, %v49_v49  }
  0x70   :  { %387 = vperm.xlu1 %1797, %v50_v56  }
  0x71   :  { %327 = vperm.xlu0 %1810, %v35_v55  }
  0x74   :  { %391 = vperm.xlu1 %1797, %v2254_v22   ;;  %v1715_v22 = vld [vmem:[%s3258_s1 + $0x1] ss:$4 sm:$0x3] }
  0x75   :  { %331 = vperm.xlu0 %1810, %v36_v57   ;;  %v2496_v30 = vrot.slane %v1715_v22, %v2480_v24  ;;  %v2505_v34 = vrot.slane %v1715_v22, %v2493_v29 }
  0x78   :  { %1798 = vset.pattern.permute.xlu1 %v2120_v7 }
  0x79   :  { %596 = vperm.xlu1 %1798, %v35_v55   ;;  %399 = vperm.xlu0 %1810, %v53_v58   ;;  %v2537_v55 = vrot.slane %v834_v44, %v2480_v24 }
  0x7d   :  { %656 = vperm.xlu1 %1798, %v50_v56   ;;  %343 = vperm.xlu0 %1810, %v2414_v59   ;;  %v2540_v56 = vrot.slane %v834_v44, %v2493_v29 }
  0x81   :  { %v2422_v61 = vpop.permute.xlu1 %73  ;;  %1799 = vset.pattern.permute.xlu1 %v2119_v1  ;;  %v2425_v62 = vpop.permute.xlu0 %299  ;;  %347 = vperm.xlu0 %1810, %v2420_v60  }
  0x82   :  { %103 = vperm.xlu1 %1799, %v36_v57   ;;  %v437_v47 = vmul.f32 %v2496_v30, %v2425_v62  ;;  %v438_v48 = vmul.f32 %v2505_v34, %v2425_v62 }
  0x85   :  { %v2436_v3 = vpop.permute.xlu1 %78  ;;  %v368_v4 = vpop.permute.xlu0 %367  ;;  %415 = vperm.xlu0 %1810, %v2431_v63  }
  0x86   :  { %183 = vperm.xlu1 %1799, %v52_v2   ;;  %v471_v38 = vmul.f32 %v2496_v30, %v368_v4  ;;  %v472_v41 = vmul.f32 %v2505_v34, %v368_v4 }
  0x89   :  { %v149_v6 = vpop.permute.xlu1 %148  ;;  %359 = vperm.xlu0 %1810, %v2442_v5  }
  0x8a   :  { %188 = vperm.xlu1 %1799, %v53_v58   ;;  %v2445_v8 = vpop.permute.xlu0 %572 }
  0x8b   :  { %v708_v62 = vmul.f32 %v2518_v40, %v2445_v8 }
  0x8d   :  { %1812 = vset.pattern.permute.xlu0 %v2120_v7 }
  0x8e   :  { %v2448_v9 = vpop.permute.xlu1 %303  ;;  %1800 = vset.pattern.permute.xlu1 %v3264_v0  ;;  %v2451_v10 = vpop.permute.xlu0 %576  ;;  %620 = vperm.xlu0 %1812, %v2377_v52  }
  0x8f   :  { %335 = vperm.xlu1 %1800, %v2266_v25   ;;  %v60_v25 = vld [vmem:[%s3258_s1] ss:$4 sm:$0x3]  ;;  %v439_v17 = vmul.f32 %v2496_v30, %v2448_v9 }
  0x90   :  { %v2502_v33 = vrot.slane %v60_v25, %v2480_v24  ;;  %v2513_v37 = vrot.slane %v60_v25, %v2493_v29  ;;  %v440_v25 = vmul.f32 %v2505_v34, %v2448_v9 }
  0x92   :  { %v2455_v11 = vpop.permute.xlu1 %363  ;;  %v2457_v12 = vpop.permute.xlu0 %644  ;;  %624 = vperm.xlu0 %1812, %v2383_v53   ;;  %v266_v39 = vmul.f32 %v2502_v33, %v149_v6  ;;  %v267_v42 = vmul.f32 %v2513_v37, %v149_v6 }
  0x93   :  { %395 = vperm.xlu1 %1800, %v52_v2   ;;  %v469_v32 = vmul.f32 %v2496_v30, %v2455_v11  ;;  %v745_v9 = vmul.f32 %v2523_v43, %v2457_v12 }
  0x94   :  { %v535_v49 = vadd.f32 %v471_v38, %v266_v39 }
  0x96   :  { %v2460_v13 = vpop.permute.xlu0 %588  ;;  %692 = vperm.xlu0 %1812, %v2389_v54  }
  0x97   :  { %1801 = vset.pattern.permute.xlu1 %v2120_v7  ;;  %v2464_v14 = vpop.permute.xlu1 %568 }
  0x98   :  { %600 = vperm.xlu1 %1801, %v36_v57  }
  0x9a   :  { %v2466_v15 = vpop.permute.xlu0 %592 }
  0x9b   :  { %v2468_v16 = vpop.permute.xlu1 %632 }
  0x9c   :  { %664 = vperm.xlu1 %1801, %v52_v2   ;;  %v536_v2 = vadd.f32 %v472_v41, %v267_v42  ;;  %v707_v41 = vmul.f32 %v2523_v43, %v2464_v14 }
  0x9e   :  { %v2470_v18 = vpop.permute.xlu0 %660 }
  0x9f   :  { %v637_v19 = vpop.permute.xlu1 %636 }
  0xa0   :  { %668 = vperm.xlu1 %1801, %v53_v58   ;;  %v740_v45 = vmul.f32 %v2518_v40, %v637_v19  ;;  %v741_v50 = vmul.f32 %v2523_v43, %v637_v19  ;;  %v706_v19 = vmul.f32 %v2518_v40, %v2464_v14 }
  0xa2   :  { %v2472_v21 = vpop.permute.xlu0 %604  ;;  %v804_v4 = vadd.f32 %v740_v45, %v535_v49  ;;  %v805_v38 = vadd.f32 %v741_v50, %v536_v2  ;;  %v738_v49 = vmul.f32 %v2518_v40, %v2468_v16 }
  0xa4   :  { %1802 = vset.pattern.permute.xlu1 %v2119_v1  ;;  %v2478_v23 = vpop.permute.xlu1 %158 }
  0xa5   :  { %118 = vperm.xlu1 %1802, %v2414_v59   ;;  %v271_v14 = vmul.f32 %v2513_v37, %v2478_v23 }
  0xa6   :  { %v2486_v26 = vpop.permute.xlu0 %608 }
  0xa9   :  { %193 = vperm.xlu1 %1802, %v2491_v27   ;;  %v2508_v35 = vpop.permute.xlu1 %307 }
  0xaa   :  { %v2510_v36 = vpop.permute.xlu0 %676 }
  0xad   :  { %1803 = vset.pattern.permute.xlu1 %v3264_v0  ;;  %v372_v46 = vpop.permute.xlu1 %371 }
  0xae   :  { %339 = vperm.xlu1 %1803, %v2279_v28   ;;  %v709_v28 = vmul.f32 %v2523_v43, %v2445_v8  ;;  %v470_v8 = vmul.f32 %v2505_v34, %v2455_v11 }
  0xaf   :  { %v64_v51 = vpop.permute.xlu0 %63 }
  0xb0   :  { %v232_v57 = vmul.f32 %v2502_v33, %v64_v51  ;;  %v233_v58 = vmul.f32 %v2513_v37, %v64_v51 }
  0xb1   :  { %v376_v6 = vpop.permute.xlu1 %375 }
  0xb2   :  { %v501_v20 = vadd.f32 %v437_v47, %v232_v57  ;;  %v502_v22 = vadd.f32 %v438_v48, %v233_v58  ;;  %403 = vperm.xlu1 %1803, %v2491_v27   ;;  %v476_v44 = vmul.f32 %v2505_v34, %v376_v6  ;;  %v744_v47 = vmul.f32 %v2518_v40, %v2457_v12 }
  0xb3   :  { %v69_v39 = vpop.permute.xlu0 %68  ;;  %v880_v48 = vadd.f32 %v2537_v55, %v804_v4  ;;  %v739_v58 = vmul.f32 %v2523_v43, %v2468_v16  ;;  %v881_v12 = vadd.f32 %v2540_v56, %v805_v38  ;;  %v473_v16 = vmul.f32 %v2496_v30, %v372_v46 }
  0xb4   :  { %v770_v42 = vadd.f32 %v706_v19, %v501_v20  ;;  %v234_v45 = vmul.f32 %v2502_v33, %v69_v39  ;;  %v235_v11 = vmul.f32 %v2513_v37, %v69_v39  ;;  %v771_v50 = vadd.f32 %v707_v41, %v502_v22 }
  0xb5   :  { %v270_v20 = vmul.f32 %v2502_v33, %v2478_v23  ;;  %v540_v39 = vadd.f32 %v476_v44, %v271_v14  ;;  %1862 = vtanh.f32 %v880_v48 }
  0xb6   :  { %v503_v51 = vadd.f32 %v439_v17, %v234_v45  ;;  %407 = vperm.xlu1 %1803, %v2292_v31   ;;  %v2574_v57 = vpop.permute.xlu1 %580  ;;  %v846_v2 = vadd.f32 %v2537_v55, %v770_v42  ;;  %v504_v4 = vadd.f32 %v440_v25, %v235_v11  ;;  %v475_v31 = vmul.f32 %v2496_v30, %v376_v6 }
  0xb7   :  { %v144_v19 = vpop.permute.xlu0 %143  ;;  %v847_v38 = vadd.f32 %v2540_v56, %v771_v50  ;;  %v809_v6 = vadd.f32 %v745_v9, %v540_v39 }
  0xb8   :  { %v772_v0 = vadd.f32 %v708_v62, %v503_v51  ;;  %v264_v17 = vmul.f32 %v2502_v33, %v144_v19  ;;  %v773_v22 = vadd.f32 %v709_v28, %v504_v4  ;;  %v265_v41 = vmul.f32 %v2513_v37, %v144_v19 }
  0xb9   :  { %v474_v62 = vmul.f32 %v2505_v34, %v372_v46  ;;  %1864 = vtanh.f32 %v846_v2  ;;  %v539_v14 = vadd.f32 %v475_v31, %v270_v20 }
  0xba   :  { %v848_v25 = vadd.f32 %v2537_v55, %v772_v0  ;;  %v533_v42 = vadd.f32 %v469_v32, %v264_v17  ;;  %1804 = vset.pattern.permute.xlu1 %v2120_v7  ;;  %v641_v23 = vpop.permute.xlu1 %640  ;;  %v849_v44 = vadd.f32 %v2540_v56, %v773_v22  ;;  %v534_v45 = vadd.f32 %v470_v8, %v265_v41 }
  0xbb   :  { %612 = vperm.xlu1 %1804, %v2414_v59   ;;  %v154_v28 = vpop.permute.xlu0 %153  ;;  %v742_v50 = vmul.f32 %v2518_v40, %v641_v23  ;;  %v743_v8 = vmul.f32 %v2523_v43, %v641_v23  ;;  %v808_v20 = vadd.f32 %v744_v47, %v539_v14  ;;  %v56_v47 = vld [vmem:[%s3256_s0 + $0xe0] sm:$0xff] }
  0xbc   :  { %1866 = vtanh.f32 %v848_v25  ;;  %v802_v48 = vadd.f32 %v738_v49, %v533_v42  ;;  %v268_v11 = vmul.f32 %v2502_v33, %v154_v28  ;;  %v803_v0 = vadd.f32 %v739_v58, %v534_v45 }
  0xbd   :  { %1868 = vtanh.f32 %v849_v44  ;;  %v269_v32 = vmul.f32 %v2513_v37, %v154_v28  ;;  %v885_v58 = vadd.f32 %v2540_v56, %v809_v6 }
  0xbe   :  { %1870 = vtanh.f32 %v847_v38  ;;  %v878_v46 = vadd.f32 %v2537_v55, %v802_v48  ;;  %v537_v51 = vadd.f32 %v473_v16, %v268_v11  ;;  %v879_v59 = vadd.f32 %v2540_v56, %v803_v0 }
  0xbf   :  { %1872 = vtanh.f32 %v881_v12  ;;  %v538_v9 = vadd.f32 %v474_v62, %v269_v32  ;;  %672 = vperm.xlu1 %1804, %v2491_v27   ;;  %v2599_v49 = vpop.permute.xlu1 %83  ;;  %v2601_v2 = vpop.permute.xlu0 %88  ;;  %v884_v16 = vadd.f32 %v2537_v55, %v808_v20 }
  0xc0   :  { %1874 = vtanh.f32 %v878_v46  ;;  %v806_v4 = vadd.f32 %v742_v50, %v537_v51  ;;  %v1863_v39 = vpop.eup %1862  ;;  %v3266_v51 = vmov 1  }
  0xc1   :  { %1876 = vtanh.f32 %v879_v59  ;;  %v807_v19 = vadd.f32 %v743_v8, %v538_v9 }
  0xc2   :  { %1878 = vtanh.f32 %v885_v58  ;;  %v882_v27 = vadd.f32 %v2537_v55, %v806_v4  ;;  %v441_v58 = vmul.f32 %v2496_v30, %v2508_v35  ;;  %v442_v4 = vmul.f32 %v2505_v34, %v2508_v35 }
  0xc3   :  { %v883_v12 = vadd.f32 %v2540_v56, %v807_v19  ;;  %1806 = vset.pattern.permute.xlu1 %v2119_v1  ;;  %v2606_v17 = vpop.permute.xlu1 %163  ;;  %v2608_v31 = vpop.permute.xlu0 %93  ;;  %v711_v35 = vmul.f32 %v2523_v43, %v2451_v10 }
  0xc4   :  { %123 = vperm.xlu1 %1806, %v2420_v60   ;;  %v1865_v22 = vpop.eup %1864 }
  0xc5   :  { %1880 = vtanh.f32 %v883_v12  ;;  %v237_v12 = vmul.f32 %v2513_v37, %v2422_v61 }
  0xc6   :  { %v1867_v41 = vpop.eup %1866  ;;  %1882 = vtanh.f32 %v882_v27 }
  0xc7   :  { %v1869_v38 = vpop.eup %1868  ;;  %v2616_v25 = vpop.permute.xlu1 %168  ;;  %v974_v62 = vpack.c.bf16 %v1867_v41, %v1865_v22  ;;  %1884 = vtanh.f32 %v884_v16  ;;  %v710_v22 = vmul.f32 %v2518_v40, %v2451_v10  ;;  %v506_v16 = vadd.f32 %v442_v4, %v237_v12 }
  0xc8   :  { %v2618_v42 = vpop.permute.xlu0 %178  ;;  %v1871_v23 = vpop.eup %1870  ;;  %203 = vperm.xlu1 %1806, %v56_v47   ;;  %v2671_v4 = vmul.f32 %v2518_v40, %v2466_v15 }
  0xc9   :  { %v1873_v44 = vpop.eup %1872  ;;  %v975_v45 = vpack.c.bf16 %v1869_v38, %v1871_v23 }
  0xca   :  { %v1875_v28 = vpop.eup %1874 }
  0xcb   :  { %v1877_v6 = vpop.eup %1876  ;;  %1242 = vmatprep.mubr.bf16.mxu0 %v975_v45  ;;  %v990_v11 = vpack.c.bf16 %v1863_v39, %v1875_v28  ;;  %v236_v39 = vmul.f32 %v2502_v33, %v2422_v61  ;;  %v775_v61 = vadd.f32 %v711_v35, %v506_v16  ;;  %v242_v45 = vmul.f32 %v2502_v33, %v2601_v2 }
  0xcc   :  { %v2620_v48 = vpop.permute.xlu0 %108  ;;  %1243 = vmatmul.mubr.bf16.vlgmr.msra.gmra.mrb[0].mxu0 %v974_v62  ;;  %208 = vperm.xlu1 %1806, %v2431_v63   ;;  %v320_v14 = vpop.permute.xlu1 %319  ;;  %v991_v0 = vpack.c.bf16 %v1873_v44, %v1877_v6  ;;  %v241_v35 = vmul.f32 %v2513_v37, %v2599_v49 }
  0xcd   :  { %v1879_v32 = vpop.eup %1878  ;;  %v505_v41 = vadd.f32 %v441_v58, %v236_v39  ;;  %v447_v28 = vmul.f32 %v2496_v30, %v320_v14  ;;  %v239_v58 = vmul.f32 %v2513_v37, %v2436_v3 }
  0xce   :  { %1322 = vmatprep.mubr.bf16.mxu1 %v991_v0 }
  0xcf   :  { %v1881_v46 = vpop.eup %1880  ;;  %1323 = vmatmul.mubr.bf16.vlgmr.msra.gmra.mrb[0].mxu1 %v990_v11  ;;  %v774_v62 = vadd.f32 %v710_v22, %v505_v41  ;;  %v851_v11 = vadd.f32 %v2540_v56, %v775_v61  ;;  %v244_v61 = vmul.f32 %v2502_v33, %v2608_v31 }
  0xd0   :  { %v2623_v50 = vpop.permute.xlu0 %113  ;;  %1807 = vset.pattern.permute.xlu1 %v3266_v51  ;;  %v380_v59 = vpop.permute.xlu1 %379  ;;  %v993_v8 = vpack.c.bf16 %v1879_v32, %v1881_v46  ;;  %v243_v32 = vmul.f32 %v2513_v37, %v2601_v2  ;;  %v448_v46 = vmul.f32 %v2505_v34, %v320_v14  ;;  %v712_v14 = vmul.f32 %v2518_v40, %v2574_v57 }
  0xd1   :  { %351 = vperm.xlu1 %1807, %v2377_v52   ;;  %v1883_v9 = vpop.eup %1882  ;;  %v850_v10 = vadd.f32 %v2537_v55, %v774_v62  ;;  %v273_v62 = vmul.f32 %v2513_v37, %v2606_v17 }
  0xd2   :  { %1332 = vmatprep.mubr.bf16.mxu1 %v993_v8  ;;  %v1885_v20 = vpop.eup %1884  ;;  %v511_v8 = vadd.f32 %v447_v28, %v242_v45  ;;  %v512_v39 = vadd.f32 %v448_v46, %v243_v32 }
  0xd3   :  { %v992_v52 = vpack.c.bf16 %v1885_v20, %v1883_v9  ;;  %v238_v9 = vmul.f32 %v2502_v33, %v2436_v3  ;;  %1886 = vtanh.f32 %v850_v10  ;;  %v477_v20 = vmul.f32 %v2496_v30, %v380_v59 }
  0xd4   :  { %v2631_v19 = vpop.permute.xlu0 %198  ;;  %1888 = vtanh.f32 %v851_v11  ;;  %v713_v3 = vmul.f32 %v2523_v43, %v2574_v57  ;;  %v274_v10 = vmul.f32 %v2502_v33, %v2616_v25 }
  0xd5   :  { %411 = vperm.xlu1 %1807, %v56_v47   ;;  %v2637_v27 = vpop.permute.xlu1 %584 }
  0xd7   :  { %1333 = vmatmul.mubr.bf16.gmra.mrb[4].mxu1 %v992_v52  ;;  %v478_v52 = vmul.f32 %v2505_v34, %v380_v59 }
  0xd8   :  { %v2643_v38 = vpop.permute.xlu0 %128 }
  0xd9   :  { %1808 = vset.pattern.permute.xlu1 %v2120_v7  ;;  %v649_v23 = vpop.permute.xlu1 %648  ;;  %v542_v46 = vadd.f32 %v478_v52, %v273_v62 }
  0xda   :  { %616 = vperm.xlu1 %1808, %v2420_v60   ;;  %v716_v60 = vmul.f32 %v2518_v40, %v2460_v13  ;;  %v746_v22 = vmul.f32 %v2518_v40, %v649_v23  ;;  %v747_v45 = vmul.f32 %v2523_v43, %v649_v23 }
  0xdc   :  { %v2647_v44 = vpop.permute.xlu0 %133  ;;  %v780_v12 = vadd.f32 %v716_v60, %v511_v8 }
  0xdd   :  { %v2652_v6 = vpop.permute.xlu1 %652 }
  0xde   :  { %680 = vperm.xlu1 %1808, %v56_v47   ;;  %v717_v47 = vmul.f32 %v2523_v43, %v2460_v13  ;;  %v272_v13 = vmul.f32 %v2502_v33, %v2606_v17  ;;  %v856_v32 = vadd.f32 %v2537_v55, %v780_v12  ;;  %v811_v12 = vadd.f32 %v747_v45, %v542_v46 }
  0xe0   :  { %v2656_v0 = vpop.permute.xlu0 %218  ;;  %v541_v59 = vadd.f32 %v477_v20, %v272_v13  ;;  %v781_v17 = vadd.f32 %v717_v47, %v512_v39  ;;  %v714_v47 = vmul.f32 %v2518_v40, %v2637_v27  ;;  %v715_v39 = vmul.f32 %v2523_v43, %v2637_v27 }
  0xe1   :  { %1890 = vtanh.f32 %v856_v32  ;;  %v748_v32 = vmul.f32 %v2518_v40, %v2652_v6 }
  0xe2   :  { %684 = vperm.xlu1 %1808, %v2431_v63   ;;  %v2675_v2 = vpop.permute.xlu1 %98  ;;  %v240_v63 = vmul.f32 %v2502_v33, %v2599_v49  ;;  %v245_v49 = vmul.f32 %v2513_v37, %v2608_v31  ;;  %v810_v8 = vadd.f32 %v746_v22, %v541_v59 }
  0xe4   :  { %v312_v41 = vpop.permute.xlu0 %311 }
  0xe5   :  { %v443_v16 = vmul.f32 %v2496_v30, %v312_v41  ;;  %v444_v57 = vmul.f32 %v2505_v34, %v312_v41 }
  0xe6   :  { %1809 = vset.pattern.permute.xlu1 %v2119_v1  ;;  %v2697_v28 = vpop.permute.xlu1 %173  ;;  %v2708_v1 = vld [vmem:[%s3256_s0 + $0xf0] sm:$0xff] }
  0xe7   :  { %v507_v11 = vadd.f32 %v443_v16, %v238_v9  ;;  %v508_v60 = vadd.f32 %v444_v57, %v239_v58  ;;  %138 = vperm.xlu1 %1809, %v2442_v5   ;;  %v275_v58 = vmul.f32 %v2513_v37, %v2616_v25  ;;  %v2721_v16 = vpop.eup %1886  ;;  %v857_v25 = vadd.f32 %v2540_v56, %v781_v17 }
  0xe8   :  { %v316_v23 = vpop.permute.xlu0 %315  ;;  %v886_v57 = vadd.f32 %v2537_v55, %v810_v8  ;;  %v2726_v59 = vpop.eup %1888 }
  0xe9   :  { %v776_v20 = vadd.f32 %v712_v14, %v507_v11  ;;  %v777_v31 = vadd.f32 %v713_v3, %v508_v60  ;;  %v445_v13 = vmul.f32 %v2496_v30, %v316_v23  ;;  %v446_v9 = vmul.f32 %v2505_v34, %v316_v23 }
  0xeb   :  { %v852_v52 = vadd.f32 %v2537_v55, %v776_v20  ;;  %v853_v22 = vadd.f32 %v2540_v56, %v777_v31  ;;  %v509_v14 = vadd.f32 %v445_v13, %v240_v63  ;;  %v510_v3 = vadd.f32 %v446_v9, %v241_v35  ;;  %213 = vperm.xlu1 %1809, %v2708_v1   ;;  %v324_v41 = vpop.permute.xlu1 %323 }
  0xec   :  { %v449_v62 = vmul.f32 %v2496_v30, %v324_v41  ;;  %v384_v27 = vpop.permute.xlu0 %383  ;;  %v887_v35 = vadd.f32 %v2540_v56, %v811_v12  ;;  %v450_v60 = vmul.f32 %v2505_v34, %v324_v41  ;;  %v719_v31 = vmul.f32 %v2523_v43, %v2466_v15 }
  0xed   :  { %1892 = vtanh.f32 %v852_v52  ;;  %v778_v45 = vadd.f32 %v714_v47, %v509_v14  ;;  %v779_v11 = vadd.f32 %v715_v39, %v510_v3  ;;  %v479_v63 = vmul.f32 %v2496_v30, %v384_v27 }
  0xee   :  { %1894 = vtanh.f32 %v853_v22  ;;  %v480_v17 = vmul.f32 %v2505_v34, %v384_v27  ;;  %v513_v8 = vadd.f32 %v449_v62, %v244_v61  ;;  %v749_v13 = vmul.f32 %v2523_v43, %v2652_v6 }
  0xef   :  { %v855_v46 = vadd.f32 %v2540_v56, %v779_v11  ;;  %v543_v23 = vadd.f32 %v479_v63, %v274_v10  ;;  %1811 = vset.pattern.permute.xlu1 %v3266_v51  ;;  %v388_v20 = vpop.permute.xlu1 %387  ;;  %1896 = vtanh.f32 %v857_v25  ;;  %v752_v47 = vmul.f32 %v2518_v40, %v2470_v18  ;;  %v2760_v25 = vpop.eup %1890 }
  0xf0   :  { %v544_v9 = vadd.f32 %v480_v17, %v275_v58  ;;  %355 = vperm.xlu1 %1811, %v2383_v53   ;;  %1898 = vtanh.f32 %v886_v57  ;;  %v854_v61 = vadd.f32 %v2537_v55, %v778_v45  ;;  %v328_v39 = vpop.permute.xlu0 %327  ;;  %v278_v51 = vmul.f32 %v2502_v33, %v2618_v42 }
  0xf1   :  { %v812_v10 = vadd.f32 %v748_v32, %v543_v23  ;;  %1900 = vtanh.f32 %v855_v46  ;;  %v514_v15 = vadd.f32 %v450_v60, %v245_v49  ;;  %v279_v6 = vmul.f32 %v2513_v37, %v2618_v42 }
  0xf2   :  { %v813_v12 = vadd.f32 %v749_v13, %v544_v9  ;;  %1902 = vtanh.f32 %v887_v35  ;;  %v782_v53 = vadd.f32 %v2671_v4, %v513_v8  ;;  %v451_v14 = vmul.f32 %v2496_v30, %v328_v39 }
  0xf3   :  { %v888_v58 = vadd.f32 %v2537_v55, %v812_v10  ;;  %v392_v52 = vpop.permute.xlu1 %391  ;;  %v452_v3 = vmul.f32 %v2505_v34, %v328_v39  ;;  %v753_v49 = vmul.f32 %v2523_v43, %v2470_v18  ;;  %v246_v42 = vmul.f32 %v2502_v33, %v2675_v2 }
  0xf4   :  { %v889_v22 = vadd.f32 %v2540_v56, %v813_v12  ;;  %v483_v41 = vmul.f32 %v2496_v30, %v392_v52  ;;  %419 = vperm.xlu1 %1811, %v2708_v1   ;;  %1904 = vtanh.f32 %v854_v61  ;;  %v484_v4 = vmul.f32 %v2505_v34, %v392_v52 }
  0xf5   :  { %v247_v57 = vmul.f32 %v2513_v37, %v2675_v2  ;;  %v783_v62 = vadd.f32 %v719_v31, %v514_v15  ;;  %1906 = vtanh.f32 %v888_v58  ;;  %v481_v11 = vmul.f32 %v2496_v30, %v388_v20 }
  0xf6   :  { %v547_v27 = vadd.f32 %v483_v41, %v278_v51  ;;  %1908 = vtanh.f32 %v889_v22  ;;  %v482_v18 = vmul.f32 %v2505_v34, %v388_v20  ;;  %v548_v63 = vadd.f32 %v484_v4, %v279_v6 }
  0xf7   :  { %v1893_v45 = vpop.eup %1892  ;;  %v858_v60 = vadd.f32 %v2537_v55, %v782_v53  ;;  %v515_v17 = vadd.f32 %v451_v14, %v246_v42  ;;  %v516_v32 = vadd.f32 %v452_v3, %v247_v57  ;;  %v276_v20 = vmul.f32 %v2502_v33, %v2697_v28 }
  0xf8   :  { %v1895_v35 = vpop.eup %1894  ;;  %423 = vperm.xlu1 %1811, %v2389_v54   ;;  %v597_v46 = vpop.permute.xlu1 %596  ;;  %v976_v2 = vpack.c.bf16 %v1893_v45, %v2721_v16  ;;  %v816_v8 = vadd.f32 %v752_v47, %v547_v27  ;;  %v277_v61 = vmul.f32 %v2513_v37, %v2697_v28  ;;  %v859_v10 = vadd.f32 %v2540_v56, %v783_v62 }
  0xf9   :  { %v720_v23 = vmul.f32 %v2518_v40, %v597_v46  ;;  %v721_v31 = vmul.f32 %v2523_v43, %v597_v46  ;;  %v977_v13 = vpack.c.bf16 %v1895_v35, %v2726_v59  ;;  %v1897_v9 = vpop.eup %1896  ;;  %v817_v54 = vadd.f32 %v753_v49, %v548_v63 }
  0xfa   :  { %v1899_v39 = vpop.eup %1898  ;;  %1910 = vtanh.f32 %v858_v60  ;;  %v545_v15 = vadd.f32 %v481_v11, %v276_v20  ;;  %v546_v12 = vadd.f32 %v482_v18, %v277_v61  ;;  %v892_v53 = vadd.f32 %v2537_v55, %v816_v8 }
  0xfb   :  { %v784_v51 = vadd.f32 %v720_v23, %v515_v17  ;;  %v785_v16 = vadd.f32 %v721_v31, %v516_v32  ;;  %1252 = vmatprep.mubr.bf16.mxu0 %v977_v13  ;;  %v1901_v47 = vpop.eup %1900  ;;  %1912 = vtanh.f32 %v859_v10  ;;  %v893_v22 = vadd.f32 %v2540_v56, %v817_v54 }
  0xfc   :  { %1253 = vmatmul.mubr.bf16.gmra.mrb[4].mxu0 %v976_v2  ;;  %1813 = vset.pattern.permute.xlu1 %v2120_v7  ;;  %v657_v59 = vpop.permute.xlu1 %656  ;;  %v1903_v6 = vpop.eup %1902  ;;  %v979_v3 = vpack.c.bf16 %v1897_v9, %v1901_v47  ;;  %v250_v31 = vmul.f32 %v2502_v33, %v2620_v48 }
  0xfd   :  { %v860_v28 = vadd.f32 %v2537_v55, %v784_v51  ;;  %v861_v58 = vadd.f32 %v2540_v56, %v785_v16  ;;  %v750_v52 = vmul.f32 %v2518_v40, %v657_v59  ;;  %628 = vperm.xlu1 %1813, %v2442_v5   ;;  %v751_v14 = vmul.f32 %v2523_v43, %v657_v59  ;;  %v332_v16 = vpop.permute.xlu0 %331 }
  0xfe   :  { %v1905_v41 = vpop.eup %1904  ;;  %1262 = vmatprep.mubr.bf16.mxu0 %v979_v3  ;;  %v725_v51 = vmul.f32 %v2523_v43, %v2472_v21 }
  0xff   :  { %1914 = vtanh.f32 %v860_v28  ;;  %v814_v7 = vadd.f32 %v750_v52, %v545_v15  ;;  %v1907_v49 = vpop.eup %1906  ;;  %v815_v42 = vadd.f32 %v751_v14, %v546_v12  ;;  %v978_v11 = vpack.c.bf16 %v2760_v25, %v1905_v41 }
 0x100   :  { %1916 = vtanh.f32 %v861_v58  ;;  %v1909_v4 = vpop.eup %1908  ;;  %v994_v62 = vpack.c.bf16 %v1907_v49, %v1899_v39  ;;  %v251_v25 = vmul.f32 %v2513_v37, %v2620_v48  ;;  %v724_v39 = vmul.f32 %v2518_v40, %v2472_v21 }
 0x101   :  { %1918 = vtanh.f32 %v892_v53  ;;  %v890_v57 = vadd.f32 %v2537_v55, %v814_v7  ;;  %688 = vperm.xlu1 %1813, %v2708_v1   ;;  %v104_v5 = vpop.permute.xlu1 %103  ;;  %v891_v27 = vadd.f32 %v2540_v56, %v815_v42  ;;  %v995_v45 = vpack.c.bf16 %v1909_v4, %v1903_v6  ;;  %v400_v52 = vpop.permute.xlu0 %399 }
 0x102   :  { %1920 = vtanh.f32 %v893_v22  ;;  %v248_v6 = vmul.f32 %v2502_v33, %v104_v5  ;;  %v249_v53 = vmul.f32 %v2513_v37, %v104_v5  ;;  %v453_v28 = vmul.f32 %v2496_v30, %v332_v16 }
 0x103   :  { %1922 = vtanh.f32 %v890_v57  ;;  %1342 = vmatprep.mubr.bf16.mxu1 %v995_v45  ;;  %v454_v58 = vmul.f32 %v2505_v34, %v332_v16  ;;  %v487_v4 = vmul.f32 %v2496_v30, %v400_v52  ;;  %v488_v57 = vmul.f32 %v2505_v34, %v400_v52 }
 0x104   :  { %1924 = vtanh.f32 %v891_v27  ;;  %1263 = vmatmul.mubr.bf16.gmra.mrb[8].mxu0 %v978_v11  ;;  %1343 = vmatmul.mubr.bf16.gmra.mrb[8].mxu1 %v994_v62  ;;  %v1911_v63 = vpop.eup %1910  ;;  %v517_v3 = vadd.f32 %v453_v28, %v248_v6  ;;  %v252_v52 = vmul.f32 %v2502_v33, %v2623_v50 }
 0x105   :  { %v184_v18 = vpop.permute.xlu1 %183  ;;  %v1913_v35 = vpop.eup %1912  ;;  %v518_v41 = vadd.f32 %v454_v58, %v249_v53 }
 0x106   :  { %v280_v42 = vmul.f32 %v2502_v33, %v184_v18  ;;  %v281_v62 = vmul.f32 %v2513_v37, %v184_v18 }
 0x109   :  { %v1915_v60 = vpop.eup %1914  ;;  %v189_v17 = vpop.permute.xlu1 %188 }
 0x10a   :  { %v1917_v32 = vpop.eup %1916  ;;  %v980_v1 = vpack.c.bf16 %v1915_v60, %v1911_v63  ;;  %v282_v63 = vmul.f32 %v2502_v33, %v189_v17 }
 0x10b   :  { %v1919_v46 = vpop.eup %1918  ;;  %v981_v2 = vpack.c.bf16 %v1917_v32, %v1913_v35  ;;  %v283_v35 = vmul.f32 %v2513_v37, %v189_v17 }
 0x10c   :  { %v1921_v8 = vpop.eup %1920 }
 0x10d   :  { %v1923_v23 = vpop.eup %1922  ;;  %1272 = vmatprep.mubr.bf16.mxu0 %v981_v2 }
 0x10e   :  { %v1925_v13 = vpop.eup %1924  ;;  %1273 = vmatmul.mubr.bf16.gmra.mrb[12].mxu0 %v980_v1  ;;  %v336_v9 = vpop.permute.xlu1 %335  ;;  %v996_v20 = vpack.c.bf16 %v1919_v46, %v1923_v23 }
 0x10f   :  { %v455_v61 = vmul.f32 %v2496_v30, %v336_v9  ;;  %v456_v10 = vmul.f32 %v2505_v34, %v336_v9  ;;  %v997_v54 = vpack.c.bf16 %v1921_v8, %v1925_v13  ;;  %v552_v13 = vadd.f32 %v488_v57, %v283_v35 }
 0x111   :  { %v519_v47 = vadd.f32 %v455_v61, %v250_v31  ;;  %v520_v15 = vadd.f32 %v456_v10, %v251_v25  ;;  %1352 = vmatprep.mubr.bf16.mxu1 %v997_v54  ;;  %v551_v31 = vadd.f32 %v487_v4, %v282_v63  ;;  %v344_v63 = vpop.permute.xlu0 %343 }
 0x112   :  { %1353 = vmatmul.mubr.bf16.gmra.mrb[12].mxu1 %v996_v20  ;;  %v396_v48 = vpop.permute.xlu1 %395 }
 0x113   :  { %v788_v12 = vadd.f32 %v724_v39, %v519_v47  ;;  %v789_v59 = vadd.f32 %v725_v51, %v520_v15  ;;  %v485_v21 = vmul.f32 %v2496_v30, %v396_v48  ;;  %v486_v27 = vmul.f32 %v2505_v34, %v396_v48 }
 0x115   :  { %v864_v22 = vadd.f32 %v2537_v55, %v788_v12  ;;  %v865_v5 = vadd.f32 %v2540_v56, %v789_v59  ;;  %v549_v60 = vadd.f32 %v485_v21, %v280_v42  ;;  %v550_v18 = vadd.f32 %v486_v27, %v281_v62 }
 0x117   :  { %v601_v14 = vpop.permute.xlu1 %600  ;;  %1926 = vtanh.f32 %v864_v22  ;;  %v253_v22 = vmul.f32 %v2513_v37, %v2623_v50 }
 0x118   :  { %v722_v7 = vmul.f32 %v2518_v40, %v601_v14  ;;  %v723_v49 = vmul.f32 %v2523_v43, %v601_v14  ;;  %1928 = vtanh.f32 %v865_v5 }
 0x11a   :  { %v786_v45 = vadd.f32 %v722_v7, %v517_v3  ;;  %v787_v11 = vadd.f32 %v723_v49, %v518_v41  ;;  %v726_v7 = vmul.f32 %v2518_v40, %v2486_v26  ;;  %v727_v49 = vmul.f32 %v2523_v43, %v2486_v26 }
 0x11b   :  { %v665_v32 = vpop.permute.xlu1 %664 }
 0x11c   :  { %v862_v1 = vadd.f32 %v2537_v55, %v786_v45  ;;  %v863_v46 = vadd.f32 %v2540_v56, %v787_v11  ;;  %v754_v2 = vmul.f32 %v2518_v40, %v665_v32  ;;  %v755_v8 = vmul.f32 %v2523_v43, %v665_v32 }
 0x11d   :  { %v287_v32 = vmul.f32 %v2513_v37, %v2631_v19 }
 0x11e   :  { %1930 = vtanh.f32 %v862_v1  ;;  %v818_v23 = vadd.f32 %v754_v2, %v549_v60  ;;  %v819_v17 = vadd.f32 %v755_v8, %v550_v18  ;;  %v286_v60 = vmul.f32 %v2502_v33, %v2631_v19 }
 0x11f   :  { %1932 = vtanh.f32 %v863_v46  ;;  %v669_v25 = vpop.permute.xlu1 %668  ;;  %v459_v8 = vmul.f32 %v2496_v30, %v344_v63  ;;  %v460_v18 = vmul.f32 %v2505_v34, %v344_v63 }
 0x120   :  { %v756_v9 = vmul.f32 %v2518_v40, %v669_v25  ;;  %v757_v20 = vmul.f32 %v2523_v43, %v669_v25  ;;  %v894_v61 = vadd.f32 %v2537_v55, %v818_v23  ;;  %v895_v39 = vadd.f32 %v2540_v56, %v819_v17 }
 0x121   :  { %v1927_v15 = vpop.eup %1926  ;;  %v760_v23 = vmul.f32 %v2518_v40, %v2510_v36 }
 0x122   :  { %v820_v10 = vadd.f32 %v756_v9, %v551_v31  ;;  %v821_v54 = vadd.f32 %v757_v20, %v552_v13  ;;  %1934 = vtanh.f32 %v894_v61  ;;  %v1929_v48 = vpop.eup %1928  ;;  %v761_v31 = vmul.f32 %v2523_v43, %v2510_v36 }
 0x124   :  { %v896_v51 = vadd.f32 %v2537_v55, %v820_v10  ;;  %v897_v16 = vadd.f32 %v2540_v56, %v821_v54  ;;  %v119_v47 = vpop.permute.xlu1 %118 }
 0x125   :  { %v254_v46 = vmul.f32 %v2502_v33, %v119_v47  ;;  %v255_v2 = vmul.f32 %v2513_v37, %v119_v47 }
 0x126   :  { %1936 = vtanh.f32 %v896_v51 }
 0x127   :  { %1938 = vtanh.f32 %v897_v16  ;;  %v523_v10 = vadd.f32 %v459_v8, %v254_v46  ;;  %v524_v54 = vadd.f32 %v460_v18, %v255_v2  ;;  %v258_v8 = vmul.f32 %v2502_v33, %v2643_v38 }
 0x128   :  { %v1931_v12 = vpop.eup %1930  ;;  %1940 = vtanh.f32 %v895_v39  ;;  %v194_v59 = vpop.permute.xlu1 %193  ;;  %v259_v18 = vmul.f32 %v2513_v37, %v2643_v38 }
 0x129   :  { %v1933_v6 = vpop.eup %1932  ;;  %v982_v53 = vpack.c.bf16 %v1927_v15, %v1931_v12  ;;  %v284_v16 = vmul.f32 %v2502_v33, %v194_v59  ;;  %v285_v12 = vmul.f32 %v2513_v37, %v194_v59 }
 0x12a   :  { %v983_v28 = vpack.c.bf16 %v1929_v48, %v1933_v6 }
 0x12c   :  { %1282 = vmatprep.mubr.bf16.mxu0 %v983_v28  ;;  %v1935_v3 = vpop.eup %1934  ;;  %v348_v28 = vpop.permute.xlu0 %347 }
 0x12d   :  { %1283 = vmatmul.mubr.bf16.gmra.mrb[16].mxu0 %v982_v53  ;;  %v340_v58 = vpop.permute.xlu1 %339  ;;  %v461_v38 = vmul.f32 %v2496_v30, %v348_v28 }
 0x12e   :  { %v457_v21 = vmul.f32 %v2496_v30, %v340_v58  ;;  %v458_v14 = vmul.f32 %v2505_v34, %v340_v58 }
 0x130   :  { %v1937_v41 = vpop.eup %1936  ;;  %v521_v42 = vadd.f32 %v457_v21, %v252_v52  ;;  %v522_v4 = vadd.f32 %v458_v14, %v253_v22 }
 0x131   :  { %v1939_v57 = vpop.eup %1938  ;;  %v404_v5 = vpop.permute.xlu1 %403  ;;  %v998_v50 = vpack.c.bf16 %v1937_v41, %v1935_v3 }
 0x132   :  { %v1941_v62 = vpop.eup %1940  ;;  %v790_v27 = vadd.f32 %v726_v7, %v521_v42  ;;  %v791_v45 = vadd.f32 %v727_v49, %v522_v4  ;;  %v489_v17 = vmul.f32 %v2496_v30, %v404_v5  ;;  %v490_v36 = vmul.f32 %v2505_v34, %v404_v5 }
 0x133   :  { %v999_v11 = vpack.c.bf16 %v1939_v57, %v1941_v62  ;;  %v416_v57 = vpop.permute.xlu0 %415 }
 0x134   :  { %v866_v13 = vadd.f32 %v2537_v55, %v790_v27  ;;  %v867_v47 = vadd.f32 %v2540_v56, %v791_v45  ;;  %v553_v6 = vadd.f32 %v489_v17, %v284_v16  ;;  %v554_v14 = vadd.f32 %v490_v36, %v285_v12 }
 0x135   :  { %1362 = vmatprep.mubr.bf16.mxu1 %v999_v11  ;;  %v408_v35 = vpop.permute.xlu1 %407 }
 0x136   :  { %1363 = vmatmul.mubr.bf16.gmra.mrb[16].mxu1 %v998_v50  ;;  %v491_v26 = vmul.f32 %v2496_v30, %v408_v35  ;;  %v492_v1 = vmul.f32 %v2505_v34, %v408_v35  ;;  %1942 = vtanh.f32 %v866_v13 }
 0x137   :  { %1944 = vtanh.f32 %v867_v47  ;;  %v2865_v45 = vpop.permute.xlu0 %359 }
 0x138   :  { %v555_v19 = vadd.f32 %v491_v26, %v286_v60  ;;  %v556_v25 = vadd.f32 %v492_v1, %v287_v32 }
 0x13a   :  { %v824_v9 = vadd.f32 %v760_v23, %v555_v19  ;;  %v825_v20 = vadd.f32 %v761_v31, %v556_v25  ;;  %v613_v61 = vpop.permute.xlu1 %612 }
 0x13b   :  { %v728_v39 = vmul.f32 %v2518_v40, %v613_v61  ;;  %v729_v51 = vmul.f32 %v2523_v43, %v613_v61  ;;  %v621_v1 = vpop.permute.xlu0 %620 }
 0x13c   :  { %v900_v58 = vadd.f32 %v2537_v55, %v824_v9  ;;  %v901_v3 = vadd.f32 %v2540_v56, %v825_v20  ;;  %v732_v17 = vmul.f32 %v2518_v40, %v621_v1  ;;  %v733_v61 = vmul.f32 %v2523_v43, %v621_v1 }
 0x13d   :  { %v792_v15 = vadd.f32 %v728_v39, %v523_v10  ;;  %v793_v48 = vadd.f32 %v729_v51, %v524_v54  ;;  %v462_v39 = vmul.f32 %v2505_v34, %v348_v28  ;;  %v496_v28 = vmul.f32 %v2505_v34, %v416_v57 }
 0x13e   :  { %v673_v53 = vpop.permute.xlu1 %672 }
 0x13f   :  { %v868_v52 = vadd.f32 %v2537_v55, %v792_v15  ;;  %v869_v22 = vadd.f32 %v2540_v56, %v793_v48  ;;  %v758_v21 = vmul.f32 %v2518_v40, %v673_v53  ;;  %v759_v41 = vmul.f32 %v2523_v43, %v673_v53 }
 0x140   :  { %v1943_v62 = vpop.eup %1942 }
 0x141   :  { %1946 = vtanh.f32 %v868_v52  ;;  %v822_v59 = vadd.f32 %v758_v21, %v553_v6  ;;  %v823_v7 = vadd.f32 %v759_v41, %v554_v14  ;;  %v1945_v27 = vpop.eup %1944  ;;  %v495_v52 = vmul.f32 %v2496_v30, %v416_v57 }
 0x142   :  { %1948 = vtanh.f32 %v869_v22 }
 0x143   :  { %1950 = vtanh.f32 %v900_v58  ;;  %v898_v49 = vadd.f32 %v2537_v55, %v822_v59  ;;  %v124_v42 = vpop.permute.xlu1 %123  ;;  %v899_v4 = vadd.f32 %v2540_v56, %v823_v7 }
 0x144   :  { %1952 = vtanh.f32 %v901_v3  ;;  %v256_v51 = vmul.f32 %v2502_v33, %v124_v42  ;;  %v257_v16 = vmul.f32 %v2513_v37, %v124_v42 }
 0x145   :  { %1954 = vtanh.f32 %v898_v49 }
 0x146   :  { %1956 = vtanh.f32 %v899_v4  ;;  %v525_v12 = vadd.f32 %v461_v38, %v256_v51  ;;  %v526_v6 = vadd.f32 %v462_v39, %v257_v16  ;;  %v625_v51 = vpop.permute.xlu0 %624 }
 0x147   :  { %v204_v5 = vpop.permute.xlu1 %203 }
 0x148   :  { %v288_v22 = vmul.f32 %v2502_v33, %v204_v5  ;;  %v289_v14 = vmul.f32 %v2513_v37, %v204_v5 }
 0x14b   :  { %v1947_v50 = vpop.eup %1946  ;;  %v209_v11 = vpop.permute.xlu1 %208 }
 0x14c   :  { %v1949_v63 = vpop.eup %1948  ;;  %v984_v35 = vpack.c.bf16 %v1947_v50, %v1943_v62  ;;  %v290_v7 = vmul.f32 %v2502_v33, %v209_v11  ;;  %v291_v49 = vmul.f32 %v2513_v37, %v209_v11 }
 0x14d   :  { %v1951_v60 = vpop.eup %1950  ;;  %v985_v32 = vpack.c.bf16 %v1949_v63, %v1945_v27 }
 0x14e   :  { %v1953_v26 = vpop.eup %1952 }
 0x14f   :  { %v1955_v46 = vpop.eup %1954  ;;  %1292 = vmatprep.mubr.bf16.mxu0 %v985_v32  ;;  %v560_v32 = vadd.f32 %v496_v28, %v291_v49 }
 0x150   :  { %v1957_v2 = vpop.eup %1956  ;;  %1293 = vmatmul.mubr.bf16.gmra.mrb[20].mxu0 %v984_v35  ;;  %v352_v23 = vpop.permute.xlu1 %351  ;;  %v1000_v31 = vpack.c.bf16 %v1951_v60, %v1955_v46  ;;  %v559_v35 = vadd.f32 %v495_v52, %v290_v7 }
 0x151   :  { %v463_v19 = vmul.f32 %v2496_v30, %v352_v23  ;;  %v464_v25 = vmul.f32 %v2505_v34, %v352_v23  ;;  %v1001_v13 = vpack.c.bf16 %v1953_v26, %v1957_v2 }
 0x153   :  { %v527_v9 = vadd.f32 %v463_v19, %v258_v8  ;;  %v528_v20 = vadd.f32 %v464_v25, %v259_v18  ;;  %1372 = vmatprep.mubr.bf16.mxu1 %v1001_v13 }
 0x154   :  { %1373 = vmatmul.mubr.bf16.gmra.mrb[20].mxu1 %v1000_v31  ;;  %v412_v10 = vpop.permute.xlu1 %411 }
 0x155   :  { %v796_v54 = vadd.f32 %v732_v17, %v527_v9  ;;  %v797_v47 = vadd.f32 %v733_v61, %v528_v20  ;;  %v493_v15 = vmul.f32 %v2496_v30, %v412_v10  ;;  %v494_v3 = vmul.f32 %v2505_v34, %v412_v10 }
 0x157   :  { %v872_v36 = vadd.f32 %v2537_v55, %v796_v54  ;;  %v873_v21 = vadd.f32 %v2540_v56, %v797_v47  ;;  %v557_v42 = vadd.f32 %v493_v15, %v288_v22  ;;  %v558_v5 = vadd.f32 %v494_v3, %v289_v14 }
 0x158   :  { %v260_v47 = vmul.f32 %v2502_v33, %v2647_v44  ;;  %v294_v14 = vmul.f32 %v2502_v33, %v2656_v0  ;;  %v295_v3 = vmul.f32 %v2513_v37, %v2656_v0  ;;  %v468_v0 = vmul.f32 %v2505_v34, %v2865_v45 }
 0x159   :  { %v617_v48 = vpop.permute.xlu1 %616  ;;  %1958 = vtanh.f32 %v872_v36 }
 0x15a   :  { %v730_v53 = vmul.f32 %v2518_v40, %v617_v48  ;;  %v731_v58 = vmul.f32 %v2523_v43, %v617_v48  ;;  %1960 = vtanh.f32 %v873_v21  ;;  %v735_v21 = vmul.f32 %v2523_v43, %v625_v51 }
 0x15c   :  { %v794_v41 = vadd.f32 %v730_v53, %v525_v12  ;;  %v795_v59 = vadd.f32 %v731_v58, %v526_v6  ;;  %v261_v6 = vmul.f32 %v2513_v37, %v2647_v44  ;;  %v734_v58 = vmul.f32 %v2518_v40, %v625_v51  ;;  %v693_v44 = vpop.permute.xlu0 %692 }
 0x15d   :  { %v681_v4 = vpop.permute.xlu1 %680 }
 0x15e   :  { %v870_v62 = vadd.f32 %v2537_v55, %v794_v41  ;;  %v871_v57 = vadd.f32 %v2540_v56, %v795_v59  ;;  %v762_v27 = vmul.f32 %v2518_v40, %v681_v4  ;;  %v763_v50 = vmul.f32 %v2523_v43, %v681_v4 }
 0x160   :  { %1962 = vtanh.f32 %v870_v62  ;;  %v826_v63 = vadd.f32 %v762_v27, %v557_v42  ;;  %v827_v11 = vadd.f32 %v763_v50, %v558_v5  ;;  %v467_v62 = vmul.f32 %v2496_v30, %v2865_v45 }
 0x161   :  { %1964 = vtanh.f32 %v871_v57  ;;  %v685_v60 = vpop.permute.xlu1 %684  ;;  %v768_v5 = vmul.f32 %v2518_v40, %v693_v44 }
 0x162   :  { %v764_v26 = vmul.f32 %v2518_v40, %v685_v60  ;;  %v765_v1 = vmul.f32 %v2523_v43, %v685_v60  ;;  %v902_v46 = vadd.f32 %v2537_v55, %v826_v63  ;;  %v903_v18 = vadd.f32 %v2540_v56, %v827_v11 }
 0x163   :  { %v1959_v25 = vpop.eup %1958 }
 0x164   :  { %v828_v2 = vadd.f32 %v764_v26, %v559_v35  ;;  %v829_v8 = vadd.f32 %v765_v1, %v560_v32  ;;  %1966 = vtanh.f32 %v902_v46  ;;  %v1961_v13 = vpop.eup %1960  ;;  %v769_v32 = vmul.f32 %v2523_v43, %v693_v44 }
 0x166   :  { %v904_v23 = vadd.f32 %v2537_v55, %v828_v2  ;;  %v905_v31 = vadd.f32 %v2540_v56, %v829_v8  ;;  %v139_v19 = vpop.permute.xlu1 %138 }
 0x167   :  { %v262_v59 = vmul.f32 %v2502_v33, %v139_v19  ;;  %v263_v4 = vmul.f32 %v2513_v37, %v139_v19 }
 0x168   :  { %1968 = vtanh.f32 %v904_v23 }
 0x169   :  { %1970 = vtanh.f32 %v905_v31  ;;  %v531_v63 = vadd.f32 %v467_v62, %v262_v59  ;;  %v532_v26 = vadd.f32 %v468_v0, %v263_v4  ;;  %v1467_v0 = vld [vmem:[%s3261_s5] sm:$0x3] }
 0x16a   :  { %v1963_v17 = vpop.eup %1962  ;;  %1972 = vtanh.f32 %v903_v18  ;;  %v214_v9 = vpop.permute.xlu1 %213 }
 0x16b   :  { %v1965_v20 = vpop.eup %1964  ;;  %v986_v61 = vpack.c.bf16 %v1959_v25, %v1963_v17  ;;  %v292_v8 = vmul.f32 %v2502_v33, %v214_v9 }
 0x16c   :  { %v987_v10 = vpack.c.bf16 %v1961_v13, %v1965_v20 }
 0x16e   :  { %1302 = vmatprep.mubr.bf16.mxu0 %v987_v10  ;;  %v1967_v39 = vpop.eup %1966 }
 0x16f   :  { %1303 = vmatmul.mubr.bf16.gmra.mrb[24].mxu0 %v986_v61  ;;  %v356_v54 = vpop.permute.xlu1 %355 }
 0x170   :  { %v465_v38 = vmul.f32 %v2496_v30, %v356_v54  ;;  %v466_v36 = vmul.f32 %v2505_v34, %v356_v54 }
 0x172   :  { %v1969_v16 = vpop.eup %1968  ;;  %v529_v53 = vadd.f32 %v465_v38, %v260_v47  ;;  %v530_v22 = vadd.f32 %v466_v36, %v261_v6 }
 0x173   :  { %v1971_v15 = vpop.eup %1970  ;;  %v420_v48 = vpop.permute.xlu1 %419  ;;  %v1002_v52 = vpack.c.bf16 %v1969_v16, %v1967_v39 }
 0x174   :  { %v1973_v12 = vpop.eup %1972  ;;  %v798_v7 = vadd.f32 %v734_v58, %v529_v53  ;;  %v799_v57 = vadd.f32 %v735_v21, %v530_v22  ;;  %v497_v60 = vmul.f32 %v2496_v30, %v420_v48  ;;  %v498_v18 = vmul.f32 %v2505_v34, %v420_v48 }
 0x175   :  { %v1003_v28 = vpack.c.bf16 %v1971_v15, %v1973_v12 }
 0x176   :  { %v874_v35 = vadd.f32 %v2537_v55, %v798_v7  ;;  %v875_v45 = vadd.f32 %v2540_v56, %v799_v57  ;;  %v561_v25 = vadd.f32 %v497_v60, %v292_v8 }
 0x177   :  { %1382 = vmatprep.mubr.bf16.mxu1 %v1003_v28  ;;  %v424_v41 = vpop.permute.xlu1 %423 }
 0x178   :  { %1383 = vmatmul.mubr.bf16.gmra.mrb[24].mxu1 %v1002_v52  ;;  %v499_v49 = vmul.f32 %v2496_v30, %v424_v41  ;;  %v500_v42 = vmul.f32 %v2505_v34, %v424_v41  ;;  %v293_v30 = vmul.f32 %v2513_v37, %v214_v9  ;;  %1974 = vtanh.f32 %v874_v35 }
 0x179   :  { %1976 = vtanh.f32 %v875_v45  ;;  %v2963_v35 = vrot.slane %v1467_v0, %v2493_v29 }
 0x17a   :  { %v563_v27 = vadd.f32 %v499_v49, %v294_v14  ;;  %v564_v50 = vadd.f32 %v500_v42, %v295_v3  ;;  %v562_v10 = vadd.f32 %v498_v18, %v293_v30 }
 0x17c   :  { %v629_v11 = vpop.permute.xlu1 %628  ;;  %v832_v1 = vadd.f32 %v768_v5, %v563_v27  ;;  %v833_v23 = vadd.f32 %v769_v32, %v564_v50  ;;  %v2960_v5 = vrot.slane %v1467_v0, %v2480_v24 }
 0x17d   :  { %v736_v46 = vmul.f32 %v2518_v40, %v629_v11  ;;  %v737_v2 = vmul.f32 %v2523_v43, %v629_v11 }
 0x17e   :  { %v908_v17 = vadd.f32 %v2537_v55, %v832_v1  ;;  %v909_v34 = vadd.f32 %v2540_v56, %v833_v23 }
 0x17f   :  { %v800_v31 = vadd.f32 %v736_v46, %v531_v63  ;;  %v801_v19 = vadd.f32 %v737_v2, %v532_v26 }
 0x180   :  { %v689_v13 = vpop.permute.xlu1 %688 }
 0x181   :  { %v876_v20 = vadd.f32 %v2537_v55, %v800_v31  ;;  %v877_v61 = vadd.f32 %v2540_v56, %v801_v19  ;;  %v766_v33 = vmul.f32 %v2518_v40, %v689_v13  ;;  %v767_v54 = vmul.f32 %v2523_v43, %v689_v13 }
 0x182   :  { %v1975_v51 = vpop.eup %1974 }
 0x183   :  { %1978 = vtanh.f32 %v876_v20  ;;  %v830_v38 = vadd.f32 %v766_v33, %v561_v25  ;;  %v831_v37 = vadd.f32 %v767_v54, %v562_v10  ;;  %v1977_v40 = vpop.eup %1976 }
 0x184   :  { %1980 = vtanh.f32 %v877_v61 }
 0x185   :  { %1982 = vtanh.f32 %v908_v17  ;;  %v906_v9 = vadd.f32 %v2537_v55, %v830_v38  ;;  %v907_v39 = vadd.f32 %v2540_v56, %v831_v37  ;;  %v1038_v55 = vld [vmem:[%s3260_s4] sm:$0x3] }
 0x186   :  { %1984 = vtanh.f32 %v909_v34  ;;  %v2943_v56 = vrot.slane %v1038_v55, %v2480_v24  ;;  %v2946_v52 = vrot.slane %v1038_v55, %v2493_v29 }
 0x187   :  { %1986 = vtanh.f32 %v906_v9 }
 0x188   :  { %1988 = vtanh.f32 %v907_v39 }
 0x18d   :  { %v1979_v16 = vpop.eup %1978 }
 0x18e   :  { %v1981_v47 = vpop.eup %1980  ;;  %v988_v36 = vpack.c.bf16 %v1979_v16, %v1975_v51 }
 0x18f   :  { %v1983_v15 = vpop.eup %1982  ;;  %v989_v48 = vpack.c.bf16 %v1981_v47, %v1977_v40 }
 0x190   :  { %v1985_v43 = vpop.eup %1984 }
 0x191   :  { %v1987_v12 = vpop.eup %1986  ;;  %1312 = vmatprep.mubr.bf16.mxu0 %v989_v48 }
 0x192   :  { %v1989_v6 = vpop.eup %1988  ;;  %1313 = vmatmul.mubr.bf16.gmra.mrb[28].mxu0 %v988_v36  ;;  %v1004_v53 = vpack.c.bf16 %v1983_v15, %v1987_v12  ;;  %v12_v15 = vstv %s3262_s6 }
 0x193   :  { %v1005_v58 = vpack.c.bf16 %v1985_v43, %v1989_v6  ;;  %13 = vst [vmem:[#allocation2] sm:$0x1] %v12_v15 }
 0x195   :  { %1392 = vmatprep.mubr.bf16.mxu1 %v1005_v58 }
 0x196   :  { %1393 = vmatmul.mubr.bf16.gmra.mrb[28].mxu1 %v1004_v53 }
 0x19f   :  { %v1244_v28 = vpop.f32.mrb[0].mxu0 }
 0x1a0   :  { %v1245_v22 = vadd.f32 %v1244_v28, %v2943_v56  ;;  %v1246_v21 = vpop.f32.mrb[1].mxu0 }
 0x1a1   :  { %v1247_v14 = vadd.f32 %v1246_v21, %v2946_v52  ;;  %v1248_v3 = vpop.f32.mrb[2].mxu0 }
 0x1a2   :  { %1990 = vtanh.f32 %v1245_v22  ;;  %v1249_v41 = vadd.f32 %v1248_v3, %v2943_v56  ;;  %v1250_v59 = vpop.f32.mrb[3].mxu0  ;;  %v1324_v7 = vpop.f32.mrb[0].mxu1 }
 0x1a3   :  { %1992 = vtanh.f32 %v1247_v14  ;;  %v1251_v44 = vadd.f32 %v1250_v59, %v2946_v52  ;;  %v1325_v49 = vadd.f32 %v1324_v7, %v2943_v56  ;;  %v1326_v42 = vpop.f32.mrb[1].mxu1 }
 0x1a4   :  { %1994 = vtanh.f32 %v1249_v41  ;;  %v1327_v4 = vadd.f32 %v1326_v42, %v2946_v52  ;;  %v1328_v62 = vpop.f32.mrb[2].mxu1 }
 0x1a5   :  { %1996 = vtanh.f32 %v1251_v44  ;;  %v1329_v57 = vadd.f32 %v1328_v62, %v2943_v56  ;;  %v1330_v27 = vpop.f32.mrb[3].mxu1 }
 0x1a6   :  { %1998 = vtanh.f32 %v1325_v49  ;;  %v1331_v50 = vadd.f32 %v1330_v27, %v2946_v52 }
 0x1a7   :  { %2000 = vtanh.f32 %v1327_v4 }
 0x1a8   :  { %2002 = vtanh.f32 %v1329_v57 }
 0x1a9   :  { %2004 = vtanh.f32 %v1331_v50 }
 0x1aa   :  { %v1334_v63 = vpop.f32.mrb[4].mxu1 }
 0x1ab   :  { %v1335_v60 = vadd.f32 %v1334_v63, %v2943_v56  ;;  %v1336_v32 = vpop.f32.mrb[5].mxu1 }
 0x1ac   :  { %v1991_v11 = vpop.eup %1990  ;;  %v1337_v26 = vadd.f32 %v1336_v32, %v2946_v52  ;;  %v1338_v1 = vpop.f32.mrb[6].mxu1 }
 0x1ad   :  { %v1993_v46 = vpop.eup %1992  ;;  %2006 = vtanh.f32 %v1335_v60  ;;  %v1339_v2 = vadd.f32 %v1338_v1, %v2943_v56  ;;  %v1340_v8 = vpop.f32.mrb[7].mxu1  ;;  %v1479_v45 = vmul.f32 %v1991_v11, %v2960_v5 }
 0x1ae   :  { %v1995_v24 = vpop.eup %1994  ;;  %2008 = vtanh.f32 %v1337_v26  ;;  %v1341_v18 = vadd.f32 %v1340_v8, %v2946_v52  ;;  %v1480_v29 = vmul.f32 %v1993_v46, %v2963_v35 }
 0x1af   :  { %v1997_v23 = vpop.eup %1996  ;;  %2010 = vtanh.f32 %v1339_v2  ;;  %v1481_v31 = vmul.f32 %v1995_v24, %v2960_v5 }
 0x1b0   :  { %v1999_v19 = vpop.eup %1998  ;;  %2012 = vtanh.f32 %v1341_v18  ;;  %v1543_v30 = vadd.f32 %v1480_v29, %v1479_v45  ;;  %v1482_v25 = vmul.f32 %v1997_v23, %v2963_v35 }
 0x1b1   :  { %v2001_v13 = vpop.eup %2000  ;;  %v1511_v17 = vmul.f32 %v1999_v19, %v2960_v5 }
 0x1b2   :  { %v2003_v20 = vpop.eup %2002  ;;  %1544 = vadd.xlane.f32.xlu1 %v1543_v30  ;;  %v1512_v61 = vmul.f32 %v2001_v13, %v2963_v35  ;;  %v1546_v33 = vadd.f32 %v1482_v25, %v1481_v31 }
 0x1b3   :  { %v2005_v10 = vpop.eup %2004  ;;  %v1513_v34 = vmul.f32 %v2003_v20, %v2960_v5 }
 0x1b4   :  { %v1591_v54 = vadd.f32 %v1512_v61, %v1511_v17  ;;  %v1514_v38 = vmul.f32 %v2005_v10, %v2963_v35 }
 0x1b6   :  { %1592 = vadd.xlane.f32.xlu0 %v1591_v54  ;;  %v1594_v37 = vadd.f32 %v1514_v38, %v1513_v34 }
 0x1b7   :  { %v2007_v9 = vpop.eup %2006 }
 0x1b8   :  { %v2009_v39 = vpop.eup %2008  ;;  %1595 = vadd.xlane.f32.xlu1 %v1594_v37  ;;  %v1515_v51 = vmul.f32 %v2007_v9, %v2960_v5 }
 0x1b9   :  { %v2011_v40 = vpop.eup %2010  ;;  %v1516_v16 = vmul.f32 %v2009_v39, %v2963_v35 }
 0x1ba   :  { %v2013_v47 = vpop.eup %2012  ;;  %1547 = vadd.xlane.f32.xlu0 %v1546_v33  ;;  %v1517_v36 = vmul.f32 %v2011_v40, %v2960_v5 }
 0x1bb   :  { %v2983_v48 = vadd.f32 %v1516_v16, %v1515_v51  ;;  %v1518_v43 = vmul.f32 %v2013_v47, %v2963_v35 }
 0x1bd   :  { %v2986_v12 = vadd.f32 %v1518_v43, %v1517_v36 }
 0x1cf   :  { %v1254_v6 = vpop.f32.mrb[4].mxu0 }
 0x1d0   :  { %v1255_v53 = vadd.f32 %v1254_v6, %v2943_v56  ;;  %v1256_v58 = vpop.f32.mrb[5].mxu0 }
 0x1d1   :  { %v1257_v55 = vadd.f32 %v1256_v58, %v2946_v52  ;;  %v1258_v28 = vpop.f32.mrb[6].mxu0 }
 0x1d2   :  { %2014 = vtanh.f32 %v1255_v53  ;;  %v1259_v22 = vadd.f32 %v1258_v28, %v2943_v56  ;;  %v1260_v21 = vpop.f32.mrb[7].mxu0 }
 0x1d3   :  { %2016 = vtanh.f32 %v1257_v55  ;;  %v1261_v14 = vadd.f32 %v1260_v21, %v2946_v52 }
 0x1d4   :  { %2018 = vtanh.f32 %v1259_v22 }
 0x1d5   :  { %2020 = vtanh.f32 %v1261_v14 }
 0x1d7   :  { %v1264_v3 = vpop.f32.mrb[8].mxu0  ;;  %v1344_v59 = vpop.f32.mrb[8].mxu1 }
 0x1d8   :  { %v1265_v41 = vadd.f32 %v1264_v3, %v2943_v56  ;;  %v1266_v7 = vpop.f32.mrb[9].mxu0  ;;  %v1345_v44 = vadd.f32 %v1344_v59, %v2943_v56  ;;  %v1346_v42 = vpop.f32.mrb[9].mxu1 }
 0x1d9   :  { %v1267_v49 = vadd.f32 %v1266_v7, %v2946_v52  ;;  %v1268_v4 = vpop.f32.mrb[10].mxu0  ;;  %v1347_v62 = vadd.f32 %v1346_v42, %v2946_v52  ;;  %v1348_v27 = vpop.f32.mrb[10].mxu1 }
 0x1da   :  { %2022 = vtanh.f32 %v1265_v41  ;;  %v1269_v57 = vadd.f32 %v1268_v4, %v2943_v56  ;;  %v1270_v50 = vpop.f32.mrb[11].mxu0  ;;  %v1349_v0 = vadd.f32 %v1348_v27, %v2943_v56  ;;  %v1350_v63 = vpop.f32.mrb[11].mxu1 }
 0x1db   :  { %2024 = vtanh.f32 %v1345_v44  ;;  %v1271_v32 = vadd.f32 %v1270_v50, %v2946_v52  ;;  %v1351_v26 = vadd.f32 %v1350_v63, %v2946_v52 }
 0x1dc   :  { %v2015_v60 = vpop.eup %2014  ;;  %2026 = vtanh.f32 %v1267_v49 }
 0x1dd   :  { %v2017_v11 = vpop.eup %2016  ;;  %2028 = vtanh.f32 %v1347_v62  ;;  %v1483_v1 = vmul.f32 %v2015_v60, %v2960_v5 }
 0x1de   :  { %v2019_v46 = vpop.eup %2018  ;;  %2030 = vtanh.f32 %v1269_v57  ;;  %v1484_v2 = vmul.f32 %v2017_v11, %v2963_v35 }
 0x1df   :  { %v2021_v8 = vpop.eup %2020  ;;  %2032 = vtanh.f32 %v1349_v0  ;;  %v1485_v45 = vmul.f32 %v2019_v46, %v2960_v5 }
 0x1e0   :  { %2034 = vtanh.f32 %v1271_v32  ;;  %v1549_v24 = vadd.f32 %v1484_v2, %v1483_v1  ;;  %v1486_v18 = vmul.f32 %v2021_v8, %v2963_v35 }
 0x1e1   :  { %2036 = vtanh.f32 %v1351_v26  ;;  %v1274_v29 = vpop.f32.mrb[12].mxu0 }
 0x1e2   :  { %v1275_v23 = vadd.f32 %v1274_v29, %v2943_v56  ;;  %1550 = vadd.xlane.f32.xlu0 %v1549_v24  ;;  %v1276_v31 = vpop.f32.mrb[13].mxu0  ;;  %v1552_v19 = vadd.f32 %v1486_v18, %v1485_v45 }
 0x1e3   :  { %v1277_v30 = vadd.f32 %v1276_v31, %v2946_v52  ;;  %v1278_v25 = vpop.f32.mrb[14].mxu0 }
 0x1e4   :  { %v2023_v13 = vpop.eup %2022  ;;  %2038 = vtanh.f32 %v1275_v23  ;;  %v1279_v17 = vadd.f32 %v1278_v25, %v2943_v56  ;;  %1553 = vadd.xlane.f32.xlu1 %v1552_v19  ;;  %v1280_v20 = vpop.f32.mrb[15].mxu0 }
 0x1e5   :  { %v2025_v61 = vpop.eup %2024  ;;  %2040 = vtanh.f32 %v1277_v30  ;;  %v1281_v33 = vadd.f32 %v1280_v20, %v2946_v52  ;;  %v1354_v10 = vpop.f32.mrb[12].mxu1  ;;  %v1487_v34 = vmul.f32 %v2023_v13, %v2960_v5 }
 0x1e6   :  { %v2027_v54 = vpop.eup %2026  ;;  %2042 = vtanh.f32 %v1279_v17  ;;  %v1355_v38 = vadd.f32 %v1354_v10, %v2943_v56  ;;  %1598 = vadd.xlane.f32.xlu0 %v2983_v48  ;;  %v1356_v37 = vpop.f32.mrb[13].mxu1  ;;  %v1519_v9 = vmul.f32 %v2025_v61, %v2960_v5 }
 0x1e7   :  { %v2029_v39 = vpop.eup %2028  ;;  %2044 = vtanh.f32 %v1281_v33  ;;  %v1357_v51 = vadd.f32 %v1356_v37, %v2946_v52  ;;  %v1358_v40 = vpop.f32.mrb[14].mxu1  ;;  %v1488_v16 = vmul.f32 %v2027_v54, %v2963_v35 }
 0x1e8   :  { %v2031_v47 = vpop.eup %2030  ;;  %2046 = vtanh.f32 %v1355_v38  ;;  %v1359_v36 = vadd.f32 %v1358_v40, %v2943_v56  ;;  %1601 = vadd.xlane.f32.xlu1 %v2986_v12  ;;  %v1360_v15 = vpop.f32.mrb[15].mxu1  ;;  %v1520_v43 = vmul.f32 %v2029_v39, %v2963_v35 }
 0x1e9   :  { %v2033_v48 = vpop.eup %2032  ;;  %2048 = vtanh.f32 %v1357_v51  ;;  %v1361_v6 = vadd.f32 %v1360_v15, %v2946_v52  ;;  %v1555_v53 = vadd.f32 %v1488_v16, %v1487_v34  ;;  %v1489_v58 = vmul.f32 %v2031_v47, %v2960_v5 }
 0x1ea   :  { %v2035_v55 = vpop.eup %2034  ;;  %2050 = vtanh.f32 %v1359_v36  ;;  %v1603_v28 = vadd.f32 %v1520_v43, %v1519_v9  ;;  %v1521_v22 = vmul.f32 %v2033_v48, %v2960_v5 }
 0x1eb   :  { %v2037_v21 = vpop.eup %2036  ;;  %2052 = vtanh.f32 %v1361_v6  ;;  %1556 = vadd.xlane.f32.xlu0 %v1555_v53  ;;  %v1490_v12 = vmul.f32 %v2035_v55, %v2963_v35 }
 0x1ec   :  { %v1522_v14 = vmul.f32 %v2037_v21, %v2963_v35 }
 0x1ed   :  { %v1558_v3 = vadd.f32 %v1490_v12, %v1489_v58 }
 0x1ee   :  { %v2039_v41 = vpop.eup %2038  ;;  %v1606_v59 = vadd.f32 %v1522_v14, %v1521_v22 }
 0x1ef   :  { %v2041_v7 = vpop.eup %2040  ;;  %1559 = vadd.xlane.f32.xlu1 %v1558_v3  ;;  %1604 = vadd.xlane.f32.xlu0 %v1603_v28  ;;  %v1491_v44 = vmul.f32 %v2039_v41, %v2960_v5 }
 0x1f0   :  { %v2043_v49 = vpop.eup %2042  ;;  %v1492_v42 = vmul.f32 %v2041_v7, %v2963_v35 }
 0x1f1   :  { %v2045_v4 = vpop.eup %2044  ;;  %v1493_v62 = vmul.f32 %v2043_v49, %v2960_v5 }
 0x1f2   :  { %v2047_v57 = vpop.eup %2046  ;;  %v1561_v27 = vadd.f32 %v1492_v42, %v1491_v44  ;;  %v1494_v50 = vmul.f32 %v2045_v4, %v2963_v35 }
 0x1f3   :  { %v2049_v0 = vpop.eup %2048  ;;  %1607 = vadd.xlane.f32.xlu1 %v1606_v59  ;;  %v1523_v63 = vmul.f32 %v2047_v57, %v2960_v5 }
 0x1f4   :  { %v2051_v60 = vpop.eup %2050  ;;  %1562 = vadd.xlane.f32.xlu0 %v1561_v27  ;;  %v1564_v32 = vadd.f32 %v1494_v50, %v1493_v62  ;;  %v1524_v11 = vmul.f32 %v2049_v0, %v2963_v35 }
 0x1f5   :  { %v2053_v26 = vpop.eup %2052  ;;  %v1525_v1 = vmul.f32 %v2051_v60, %v2960_v5 }
 0x1f6   :  { %v1609_v46 = vadd.f32 %v1524_v11, %v1523_v63  ;;  %v1526_v2 = vmul.f32 %v2053_v26, %v2963_v35 }
 0x1f7   :  { %1565 = vadd.xlane.f32.xlu1 %v1564_v32 }
 0x1f8   :  { %1610 = vadd.xlane.f32.xlu0 %v1609_v46  ;;  %v1612_v8 = vadd.f32 %v1526_v2, %v1525_v1 }
 0x1fb   :  { %1613 = vadd.xlane.f32.xlu1 %v1612_v8 }
 0x200   :  { %v1284_v45 = vpop.f32.mrb[16].mxu0 }
 0x201   :  { %v1285_v24 = vadd.f32 %v1284_v45, %v2943_v56  ;;  %v1286_v18 = vpop.f32.mrb[17].mxu0 }
 0x202   :  { %v1287_v29 = vadd.f32 %v1286_v18, %v2946_v52  ;;  %v1288_v23 = vpop.f32.mrb[18].mxu0 }
 0x203   :  { %2054 = vtanh.f32 %v1285_v24  ;;  %v1289_v31 = vadd.f32 %v1288_v23, %v2943_v56  ;;  %v1290_v19 = vpop.f32.mrb[19].mxu0 }
 0x204   :  { %2056 = vtanh.f32 %v1287_v29  ;;  %v1291_v30 = vadd.f32 %v1290_v19, %v2946_v52 }
 0x205   :  { %2058 = vtanh.f32 %v1289_v31 }
 0x206   :  { %2060 = vtanh.f32 %v1291_v30 }
 0x209   :  { %v1364_v25 = vpop.f32.mrb[16].mxu1 }
 0x20a   :  { %v1365_v13 = vadd.f32 %v1364_v25, %v2943_v56  ;;  %v1366_v17 = vpop.f32.mrb[17].mxu1 }
 0x20b   :  { %v1367_v20 = vadd.f32 %v1366_v17, %v2946_v52  ;;  %v1368_v61 = vpop.f32.mrb[18].mxu1 }
 0x20c   :  { %2062 = vtanh.f32 %v1365_v13  ;;  %v1369_v33 = vadd.f32 %v1368_v61, %v2943_v56  ;;  %v1370_v10 = vpop.f32.mrb[19].mxu1  ;;  %v3062_v61 = vld [vmem:[#allocation2] ss:$0 sm:$0xff] }
 0x20d   :  { %v2055_v34 = vpop.eup %2054  ;;  %2064 = vtanh.f32 %v1367_v20  ;;  %v1371_v54 = vadd.f32 %v1370_v10, %v2946_v52 }
 0x20e   :  { %v2057_v38 = vpop.eup %2056  ;;  %2066 = vtanh.f32 %v1369_v33  ;;  %v1495_v37 = vmul.f32 %v2055_v34, %v2960_v5 }
 0x20f   :  { %v2059_v9 = vpop.eup %2058  ;;  %2068 = vtanh.f32 %v1371_v54  ;;  %v1496_v39 = vmul.f32 %v2057_v38, %v2963_v35 }
 0x210   :  { %v2061_v51 = vpop.eup %2060  ;;  %v1497_v40 = vmul.f32 %v2059_v9, %v2960_v5 }
 0x211   :  { %v1567_v16 = vadd.f32 %v1496_v39, %v1495_v37  ;;  %v1498_v47 = vmul.f32 %v2061_v51, %v2963_v35 }
 0x213   :  { %1568 = vadd.xlane.f32.xlu0 %v1567_v16  ;;  %v1570_v36 = vadd.f32 %v1498_v47, %v1497_v40 }
 0x215   :  { %1571 = vadd.xlane.f32.xlu1 %v1570_v36 }
 0x216   :  { %v2063_v15 = vpop.eup %2062 }
 0x217   :  { %v2065_v43 = vpop.eup %2064  ;;  %v1527_v48 = vmul.f32 %v2063_v15, %v2960_v5 }
 0x218   :  { %v2067_v6 = vpop.eup %2066  ;;  %v1528_v53 = vmul.f32 %v2065_v43, %v2963_v35 }
 0x219   :  { %v2069_v58 = vpop.eup %2068  ;;  %v1529_v55 = vmul.f32 %v2067_v6, %v2960_v5 }
 0x21a   :  { %v1615_v28 = vadd.f32 %v1528_v53, %v1527_v48  ;;  %v1530_v22 = vmul.f32 %v2069_v58, %v2963_v35 }
 0x21c   :  { %1616 = vadd.xlane.f32.xlu0 %v1615_v28  ;;  %v1618_v21 = vadd.f32 %v1530_v22, %v1529_v55 }
 0x21e   :  { %1619 = vadd.xlane.f32.xlu1 %v1618_v21 }
 0x223   :  { %v1294_v12 = vpop.f32.mrb[20].mxu0 }
 0x224   :  { %v1295_v14 = vadd.f32 %v1294_v12, %v2943_v56  ;;  %v1296_v3 = vpop.f32.mrb[21].mxu0 }
 0x225   :  { %v1297_v41 = vadd.f32 %v1296_v3, %v2946_v52  ;;  %v1298_v59 = vpop.f32.mrb[22].mxu0 }
 0x226   :  { %2070 = vtanh.f32 %v1295_v14  ;;  %v1299_v7 = vadd.f32 %v1298_v59, %v2943_v56  ;;  %v1300_v44 = vpop.f32.mrb[23].mxu0 }
 0x227   :  { %2072 = vtanh.f32 %v1297_v41  ;;  %v1301_v49 = vadd.f32 %v1300_v44, %v2946_v52  ;;  %v1374_v42 = vpop.f32.mrb[20].mxu1 }
 0x228   :  { %2074 = vtanh.f32 %v1299_v7  ;;  %v1375_v4 = vadd.f32 %v1374_v42, %v2943_v56  ;;  %v1376_v62 = vpop.f32.mrb[21].mxu1 }
 0x229   :  { %2076 = vtanh.f32 %v1301_v49  ;;  %v1377_v57 = vadd.f32 %v1376_v62, %v2946_v52  ;;  %v1378_v27 = vpop.f32.mrb[22].mxu1 }
 0x22a   :  { %2078 = vtanh.f32 %v1375_v4  ;;  %v1379_v50 = vadd.f32 %v1378_v27, %v2943_v56  ;;  %v1380_v0 = vpop.f32.mrb[23].mxu1 }
 0x22b   :  { %2080 = vtanh.f32 %v1377_v57  ;;  %v1381_v63 = vadd.f32 %v1380_v0, %v2946_v52 }
 0x22c   :  { %2082 = vtanh.f32 %v1379_v50 }
 0x22d   :  { %2084 = vtanh.f32 %v1381_v63 }
 0x230   :  { %v2071_v60 = vpop.eup %2070 }
 0x231   :  { %v2073_v32 = vpop.eup %2072  ;;  %v1499_v11 = vmul.f32 %v2071_v60, %v2960_v5 }
 0x232   :  { %v2075_v26 = vpop.eup %2074  ;;  %v1500_v1 = vmul.f32 %v2073_v32, %v2963_v35 }
 0x233   :  { %v2077_v46 = vpop.eup %2076  ;;  %v1501_v2 = vmul.f32 %v2075_v26, %v2960_v5 }
 0x234   :  { %v2079_v8 = vpop.eup %2078  ;;  %v1573_v45 = vadd.f32 %v1500_v1, %v1499_v11  ;;  %v1502_v24 = vmul.f32 %v2077_v46, %v2963_v35 }
 0x235   :  { %v2081_v18 = vpop.eup %2080  ;;  %v1531_v29 = vmul.f32 %v2079_v8, %v2960_v5 }
 0x236   :  { %v2083_v23 = vpop.eup %2082  ;;  %1574 = vadd.xlane.f32.xlu0 %v1573_v45  ;;  %v1576_v31 = vadd.f32 %v1502_v24, %v1501_v2  ;;  %v1532_v19 = vmul.f32 %v2081_v18, %v2963_v35 }
 0x237   :  { %v2085_v30 = vpop.eup %2084  ;;  %v1533_v25 = vmul.f32 %v2083_v23, %v2960_v5 }
 0x238   :  { %1577 = vadd.xlane.f32.xlu1 %v1576_v31  ;;  %v1621_v13 = vadd.f32 %v1532_v19, %v1531_v29  ;;  %v1534_v17 = vmul.f32 %v2085_v30, %v2963_v35 }
 0x23a   :  { %1622 = vadd.xlane.f32.xlu0 %v1621_v13  ;;  %v1624_v20 = vadd.f32 %v1534_v17, %v1533_v25 }
 0x23c   :  { %1625 = vadd.xlane.f32.xlu1 %v1624_v20 }
 0x23f   :  { %v1545_v33 = vpop.xlane.xlu1 %1544 }
 0x240   :  { %v1646_v10 = vadd.f32 %v3062_v61, %v1545_v33 }
 0x242   :  { %1679 = vst.msk [vmem:[%s3263_s7] sm:$0xff] %vm1678_vm0, %v1646_v10  ;;  %v1304_v34 = vpop.f32.mrb[24].mxu0 }
 0x243   :  { %v1305_v54 = vadd.f32 %v1304_v34, %v2943_v56  ;;  %v1593_v38 = vpop.xlane.xlu0 %1592  ;;  %v1306_v37 = vpop.f32.mrb[25].mxu0 }
 0x244   :  { %v1662_v9 = vadd.f32 %v3062_v61, %v1593_v38  ;;  %v1307_v39 = vadd.f32 %v1306_v37, %v2946_v52  ;;  %v1308_v51 = vpop.f32.mrb[26].mxu0 }
 0x245   :  { %2086 = vtanh.f32 %v1305_v54  ;;  %v1596_v40 = vpop.xlane.xlu1 %1595  ;;  %v1309_v16 = vadd.f32 %v1308_v51, %v2943_v56  ;;  %v1310_v47 = vpop.f32.mrb[27].mxu0 }
 0x246   :  { %1695 = vst.msk [vmem:[%s3263_s7 + $0x80] sm:$0xff] %vm1678_vm0, %v1662_v9  ;;  %2088 = vtanh.f32 %v1307_v39  ;;  %v1663_v36 = vadd.f32 %v3062_v61, %v1596_v40  ;;  %v1311_v15 = vadd.f32 %v1310_v47, %v2946_v52 }
 0x247   :  { %2090 = vtanh.f32 %v1309_v16  ;;  %v1548_v43 = vpop.xlane.xlu0 %1547 }
 0x248   :  { %1696 = vst.msk [vmem:[%s3263_s7 + $0x88] sm:$0xff] %vm1678_vm0, %v1663_v36  ;;  %2092 = vtanh.f32 %v1311_v15  ;;  %v1647_v48 = vadd.f32 %v3062_v61, %v1548_v43 }
 0x24a   :  { %1680 = vst.msk [vmem:[%s3263_s7 + $0x8] sm:$0xff] %vm1678_vm0, %v1647_v48 }
 0x24b   :  { %v1384_v6 = vpop.f32.mrb[24].mxu1 }
 0x24c   :  { %v1385_v53 = vadd.f32 %v1384_v6, %v2943_v56  ;;  %v1386_v58 = vpop.f32.mrb[25].mxu1 }
 0x24d   :  { %v1387_v55 = vadd.f32 %v1386_v58, %v2946_v52  ;;  %v1388_v28 = vpop.f32.mrb[26].mxu1 }
 0x24e   :  { %2094 = vtanh.f32 %v1385_v53  ;;  %v1389_v22 = vadd.f32 %v1388_v28, %v2943_v56  ;;  %v1390_v21 = vpop.f32.mrb[27].mxu1 }
 0x24f   :  { %v2087_v12 = vpop.eup %2086  ;;  %2096 = vtanh.f32 %v1387_v55  ;;  %v1391_v14 = vadd.f32 %v1390_v21, %v2946_v52 }
 0x250   :  { %v2089_v3 = vpop.eup %2088  ;;  %2098 = vtanh.f32 %v1389_v22  ;;  %v1503_v41 = vmul.f32 %v2087_v12, %v2960_v5 }
 0x251   :  { %v2091_v59 = vpop.eup %2090  ;;  %2100 = vtanh.f32 %v1391_v14  ;;  %v1504_v7 = vmul.f32 %v2089_v3, %v2963_v35 }
 0x252   :  { %v2093_v44 = vpop.eup %2092  ;;  %v1505_v49 = vmul.f32 %v2091_v59, %v2960_v5 }
 0x253   :  { %v1579_v42 = vadd.f32 %v1504_v7, %v1503_v41  ;;  %v1506_v4 = vmul.f32 %v2093_v44, %v2963_v35 }
 0x255   :  { %1580 = vadd.xlane.f32.xlu0 %v1579_v42  ;;  %v1582_v62 = vadd.f32 %v1506_v4, %v1505_v49 }
 0x257   :  { %1583 = vadd.xlane.f32.xlu1 %v1582_v62 }
 0x258   :  { %v2095_v57 = vpop.eup %2094 }
 0x259   :  { %v2097_v27 = vpop.eup %2096  ;;  %v1535_v50 = vmul.f32 %v2095_v57, %v2960_v5 }
 0x25a   :  { %v2099_v0 = vpop.eup %2098  ;;  %v1536_v63 = vmul.f32 %v2097_v27, %v2963_v35 }
 0x25b   :  { %v2101_v60 = vpop.eup %2100  ;;  %v1537_v32 = vmul.f32 %v2099_v0, %v2960_v5 }
 0x25c   :  { %v1627_v11 = vadd.f32 %v1536_v63, %v1535_v50  ;;  %v1538_v26 = vmul.f32 %v2101_v60, %v2963_v35 }
 0x25e   :  { %1628 = vadd.xlane.f32.xlu0 %v1627_v11  ;;  %v1630_v1 = vadd.f32 %v1538_v26, %v1537_v32 }
 0x260   :  { %1631 = vadd.xlane.f32.xlu1 %v1630_v1 }
 0x265   :  { %v1314_v46 = vpop.f32.mrb[28].mxu0 }
 0x266   :  { %v1315_v2 = vadd.f32 %v1314_v46, %v2943_v56  ;;  %v1316_v8 = vpop.f32.mrb[29].mxu0 }
 0x267   :  { %v1317_v45 = vadd.f32 %v1316_v8, %v2946_v52  ;;  %v1318_v24 = vpop.f32.mrb[30].mxu0 }
 0x268   :  { %2102 = vtanh.f32 %v1315_v2  ;;  %v1319_v18 = vadd.f32 %v1318_v24, %v2943_v56  ;;  %v1320_v29 = vpop.f32.mrb[31].mxu0 }
 0x269   :  { %2104 = vtanh.f32 %v1317_v45  ;;  %v1321_v23 = vadd.f32 %v1320_v29, %v2946_v52  ;;  %v1394_v31 = vpop.f32.mrb[28].mxu1 }
 0x26a   :  { %2106 = vtanh.f32 %v1319_v18  ;;  %v1395_v19 = vadd.f32 %v1394_v31, %v2943_v56  ;;  %v1396_v30 = vpop.f32.mrb[29].mxu1 }
 0x26b   :  { %2108 = vtanh.f32 %v1321_v23  ;;  %v1397_v25 = vadd.f32 %v1396_v30, %v2946_v52  ;;  %v1398_v13 = vpop.f32.mrb[30].mxu1 }
 0x26c   :  { %2110 = vtanh.f32 %v1395_v19  ;;  %v1399_v17 = vadd.f32 %v1398_v13, %v2943_v56  ;;  %v1400_v20 = vpop.f32.mrb[31].mxu1 }
 0x26d   :  { %2112 = vtanh.f32 %v1397_v25  ;;  %v1401_v33 = vadd.f32 %v1400_v20, %v2946_v52 }
 0x26e   :  { %2114 = vtanh.f32 %v1399_v17 }
 0x26f   :  { %2116 = vtanh.f32 %v1401_v33  ;;  %v1551_v10 = vpop.xlane.xlu0 %1550 }
 0x270   :  { %v1648_v34 = vadd.f32 %v3062_v61, %v1551_v10 }
 0x271   :  { %v1554_v54 = vpop.xlane.xlu1 %1553 }
 0x272   :  { %v2103_v38 = vpop.eup %2102  ;;  %1681 = vst.msk [vmem:[%s3263_s7 + $0x10] sm:$0xff] %vm1678_vm0, %v1648_v34  ;;  %v1649_v37 = vadd.f32 %v3062_v61, %v1554_v54 }
 0x273   :  { %v2105_v9 = vpop.eup %2104  ;;  %v1599_v56 = vpop.xlane.xlu0 %1598  ;;  %v1507_v39 = vmul.f32 %v2103_v38, %v2960_v5 }
 0x274   :  { %v2107_v51 = vpop.eup %2106  ;;  %1682 = vst.msk [vmem:[%s3263_s7 + $0x18] sm:$0xff] %vm1678_vm0, %v1649_v37  ;;  %v1664_v52 = vadd.f32 %v3062_v61, %v1599_v56  ;;  %v1508_v40 = vmul.f32 %v2105_v9, %v2963_v35 }
 0x275   :  { %v2109_v16 = vpop.eup %2108  ;;  %v1602_v47 = vpop.xlane.xlu1 %1601  ;;  %v1509_v36 = vmul.f32 %v2107_v51, %v2960_v5 }
 0x276   :  { %v2111_v15 = vpop.eup %2110  ;;  %1697 = vst.msk [vmem:[%s3263_s7 + $0x90] sm:$0xff] %vm1678_vm0, %v1664_v52  ;;  %v1665_v43 = vadd.f32 %v3062_v61, %v1602_v47  ;;  %v1585_v48 = vadd.f32 %v1508_v40, %v1507_v39  ;;  %v1510_v6 = vmul.f32 %v2109_v16, %v2963_v35 }
 0x277   :  { %v2113_v53 = vpop.eup %2112  ;;  %v1539_v58 = vmul.f32 %v2111_v15, %v2960_v5 }
 0x278   :  { %v2115_v55 = vpop.eup %2114  ;;  %1698 = vst.msk [vmem:[%s3263_s7 + $0x98] sm:$0xff] %vm1678_vm0, %v1665_v43  ;;  %v1557_v28 = vpop.xlane.xlu0 %1556  ;;  %1586 = vadd.xlane.f32.xlu0 %v1585_v48  ;;  %v1588_v22 = vadd.f32 %v1510_v6, %v1509_v36  ;;  %v1540_v21 = vmul.f32 %v2113_v53, %v2963_v35 }
 0x279   :  { %v2117_v12 = vpop.eup %2116  ;;  %v1650_v14 = vadd.f32 %v3062_v61, %v1557_v28  ;;  %v1541_v3 = vmul.f32 %v2115_v55, %v2960_v5 }
 0x27a   :  { %1589 = vadd.xlane.f32.xlu1 %v1588_v22  ;;  %v1633_v41 = vadd.f32 %v1540_v21, %v1539_v58  ;;  %v1542_v59 = vmul.f32 %v2117_v12, %v2963_v35 }
 0x27b   :  { %1683 = vst.msk [vmem:[%s3263_s7 + $0x20] sm:$0xff] %vm1678_vm0, %v1650_v14 }
 0x27c   :  { %v1560_v7 = vpop.xlane.xlu1 %1559  ;;  %v1605_v44 = vpop.xlane.xlu0 %1604  ;;  %1634 = vadd.xlane.f32.xlu0 %v1633_v41  ;;  %v1636_v49 = vadd.f32 %v1542_v59, %v1541_v3 }
 0x27d   :  { %v1651_v42 = vadd.f32 %v3062_v61, %v1560_v7  ;;  %v1666_v4 = vadd.f32 %v3062_v61, %v1605_v44 }
 0x27e   :  { %1637 = vadd.xlane.f32.xlu1 %v1636_v49 }
 0x27f   :  { %1684 = vst.msk [vmem:[%s3263_s7 + $0x28] sm:$0xff] %vm1678_vm0, %v1651_v42  ;;  %1699 = vst.msk [vmem:[%s3263_s7 + $0xa0] sm:$0xff] %vm1678_vm0, %v1666_v4 }
 0x280   :  { %v1608_v5 = vpop.xlane.xlu1 %1607 }
 0x281   :  { %v1667_v35 = vadd.f32 %v3062_v61, %v1608_v5  ;;  %v1563_v62 = vpop.xlane.xlu0 %1562 }
 0x282   :  { %v1652_v57 = vadd.f32 %v3062_v61, %v1563_v62 }
 0x283   :  { %1700 = vst.msk [vmem:[%s3263_s7 + $0xa8] sm:$0xff] %vm1678_vm0, %v1667_v35 }
 0x284   :  { %1685 = vst.msk [vmem:[%s3263_s7 + $0x30] sm:$0xff] %vm1678_vm0, %v1652_v57  ;;  %v1566_v27 = vpop.xlane.xlu1 %1565 }
 0x285   :  { %v1653_v50 = vadd.f32 %v3062_v61, %v1566_v27  ;;  %v1611_v0 = vpop.xlane.xlu0 %1610 }
 0x286   :  { %v1668_v63 = vadd.f32 %v3062_v61, %v1611_v0 }
 0x287   :  { %1686 = vst.msk [vmem:[%s3263_s7 + $0x38] sm:$0xff] %vm1678_vm0, %v1653_v50 }
 0x288   :  { %1701 = vst.msk [vmem:[%s3263_s7 + $0xb0] sm:$0xff] %vm1678_vm0, %v1668_v63  ;;  %v1614_v60 = vpop.xlane.xlu1 %1613 }
 0x289   :  { %v1669_v32 = vadd.f32 %v3062_v61, %v1614_v60 }
 0x28b   :  { %1702 = vst.msk [vmem:[%s3263_s7 + $0xb8] sm:$0xff] %vm1678_vm0, %v1669_v32 }
 0x2a0   :  { %v1569_v11 = vpop.xlane.xlu0 %1568 }
 0x2a1   :  { %v1654_v26 = vadd.f32 %v3062_v61, %v1569_v11 }
 0x2a2   :  { %v1572_v1 = vpop.xlane.xlu1 %1571 }
 0x2a3   :  { %1687 = vst.msk [vmem:[%s3263_s7 + $0x40] sm:$0xff] %vm1678_vm0, %v1654_v26  ;;  %v1655_v46 = vadd.f32 %v3062_v61, %v1572_v1 }
 0x2a5   :  { %1688 = vst.msk [vmem:[%s3263_s7 + $0x48] sm:$0xff] %vm1678_vm0, %v1655_v46 }
 0x2a9   :  { %v1617_v2 = vpop.xlane.xlu0 %1616 }
 0x2aa   :  { %v1670_v8 = vadd.f32 %v3062_v61, %v1617_v2 }
 0x2ab   :  { %v1620_v45 = vpop.xlane.xlu1 %1619 }
 0x2ac   :  { %1703 = vst.msk [vmem:[%s3263_s7 + $0xc0] sm:$0xff] %vm1678_vm0, %v1670_v8  ;;  %v1671_v24 = vadd.f32 %v3062_v61, %v1620_v45 }
 0x2ae   :  { %1704 = vst.msk [vmem:[%s3263_s7 + $0xc8] sm:$0xff] %vm1678_vm0, %v1671_v24 }
 0x2c3   :  { %v1575_v18 = vpop.xlane.xlu0 %1574 }
 0x2c4   :  { %v1656_v29 = vadd.f32 %v3062_v61, %v1575_v18 }
 0x2c5   :  { %v1578_v23 = vpop.xlane.xlu1 %1577 }
 0x2c6   :  { %1689 = vst.msk [vmem:[%s3263_s7 + $0x50] sm:$0xff] %vm1678_vm0, %v1656_v29  ;;  %v1657_v31 = vadd.f32 %v3062_v61, %v1578_v23 }
 0x2c7   :  { %v1623_v19 = vpop.xlane.xlu0 %1622 }
 0x2c8   :  { %1690 = vst.msk [vmem:[%s3263_s7 + $0x58] sm:$0xff] %vm1678_vm0, %v1657_v31  ;;  %v1672_v30 = vadd.f32 %v3062_v61, %v1623_v19 }
 0x2c9   :  { %v1626_v25 = vpop.xlane.xlu1 %1625 }
 0x2ca   :  { %1705 = vst.msk [vmem:[%s3263_s7 + $0xd0] sm:$0xff] %vm1678_vm0, %v1672_v30  ;;  %v1673_v13 = vadd.f32 %v3062_v61, %v1626_v25 }
 0x2cc   :  { %1706 = vst.msk [vmem:[%s3263_s7 + $0xd8] sm:$0xff] %vm1678_vm0, %v1673_v13 }
 0x2e2   :  { %v1581_v17 = vpop.xlane.xlu0 %1580 }
 0x2e3   :  { %v1658_v20 = vadd.f32 %v3062_v61, %v1581_v17 }
 0x2e4   :  { %v1584_v33 = vpop.xlane.xlu1 %1583 }
 0x2e5   :  { %1691 = vst.msk [vmem:[%s3263_s7 + $0x60] sm:$0xff] %vm1678_vm0, %v1658_v20  ;;  %v1659_v10 = vadd.f32 %v3062_v61, %v1584_v33 }
 0x2e7   :  { %1692 = vst.msk [vmem:[%s3263_s7 + $0x68] sm:$0xff] %vm1678_vm0, %v1659_v10 }
 0x2eb   :  { %v1629_v34 = vpop.xlane.xlu0 %1628 }
 0x2ec   :  { %v1674_v54 = vadd.f32 %v3062_v61, %v1629_v34 }
 0x2ed   :  { %v1632_v38 = vpop.xlane.xlu1 %1631 }
 0x2ee   :  { %1707 = vst.msk [vmem:[%s3263_s7 + $0xe0] sm:$0xff] %vm1678_vm0, %v1674_v54  ;;  %v1675_v37 = vadd.f32 %v3062_v61, %v1632_v38 }
 0x2f0   :  { %1708 = vst.msk [vmem:[%s3263_s7 + $0xe8] sm:$0xff] %vm1678_vm0, %v1675_v37 }
 0x305   :  { %v1587_v9 = vpop.xlane.xlu0 %1586 }
 0x306   :  { %v1660_v56 = vadd.f32 %v3062_v61, %v1587_v9 }
 0x307   :  { %v1590_v39 = vpop.xlane.xlu1 %1589 }
 0x308   :  { %1693 = vst.msk [vmem:[%s3263_s7 + $0x70] sm:$0xff] %vm1678_vm0, %v1660_v56  ;;  %v1661_v51 = vadd.f32 %v3062_v61, %v1590_v39 }
 0x309   :  { %v1635_v52 = vpop.xlane.xlu0 %1634 }
 0x30a   :  { %1694 = vst.msk [vmem:[%s3263_s7 + $0x78] sm:$0xff] %vm1678_vm0, %v1661_v51  ;;  %v1676_v40 = vadd.f32 %v3062_v61, %v1635_v52 }
 0x30b   :  { %v1638_v16 = vpop.xlane.xlu1 %1637 }
 0x30c   :  { %1709 = vst.msk [vmem:[%s3263_s7 + $0xf0] sm:$0xff] %vm1678_vm0, %v1676_v40  ;;  %v1677_v47 = vadd.f32 %v3062_v61, %v1638_v16 }
 0x30e   :  { %1710 = vst.msk [vmem:[%s3263_s7 + $0xf8] sm:$0xff] %vm1678_vm0, %v1677_v47 }

</bundles_post_ra>
